<compile_context>
chip_gen: v5e
topology: v5e:2x2
jax: 0.10.0
libtpu: 0.0.40
codegen_flags: <defaults>
</compile_context>

<pallas_src>
import jax
import jax.numpy as jnp
from jax import lax
from jax.experimental import pallas as pl
from jax.experimental.pallas import tpu as pltpu


def dan_kernel(x_ref, ew_ref, b_ref, o_ref):
    """Grid = (batch tiles,) — the full vocab is resident per step.

    x_ref:  (tn, vocab)  bag-of-words counts (bf16 stream; exact for counts < 256)
    ew_ref: (6, vocab)   rows 0:3 = hi([E @ W.T | 1].T), rows 3:6 = lo residual
    b_ref:  (1, 2)       Linear bias (f32)
    o_ref:  (tn, 2)      output logits (f32)
    """
    # One MXU contraction over vocab produces [num0, num1, sum(x)] for hi and lo parts.
    acc6 = lax.dot_general(
        x_ref[...], ew_ref[...],
        dimension_numbers=(((1,), (1,)), ((), ())),   # contract last dims (NT matmul)
        preferred_element_type=jnp.float32,
    )                                                 # (tn, 6) f32
    acc = acc6[:, 0:3] + acc6[:, 3:6]                 # hi + lo -> f32-accurate (tn, 3)
    inv = pl.reciprocal(acc[:, 2:3], approx=False)    # exact 1 / sum(x)
    o_ref[...] = (acc[:, 0:2] * inv + b_ref[...]).astype(o_ref.dtype)


def dan_prepare_params(embeds, fc_weight, *, stream_dtype=jnp.bfloat16):
    """One-time per-model precompute.

    Returns a lane-dense (6, vocab) array in `stream_dtype`:
      rows 0:3 = hi of [E @ W.T | 1].T, rows 3:6 = lo residual (hi + lo ~= f32 exact),
    so the HBM stream is 16-bit without losing the f32 accuracy of E @ W.T.
    """
    ew = jnp.dot(embeds.astype(jnp.float32), fc_weight.astype(jnp.float32).T,
                 precision=lax.Precision.HIGHEST)                     # (vocab, 2)
    ones = jnp.ones((embeds.shape[0], 1), jnp.float32)
    ew3t = jnp.concatenate([ew, ones], axis=1).T                      # (3, vocab) f32
    hi = ew3t.astype(stream_dtype)
    lo = (ew3t - hi.astype(jnp.float32)).astype(stream_dtype)
    return jnp.concatenate([hi, lo], axis=0)                          # (6, vocab)


def dan_forward(x, ew6, fc_bias, *, tn=256, vmem_limit_bytes=32 * 1024 * 1024):
    """x: (n, vocab) counts; ew6: (6, vocab) from dan_prepare_params; fc_bias: (2,).

    No padding copies of x are made: the vocab axis is consumed whole per grid step
    (block dim == full array dim, so no 128-alignment requirement), and a ragged batch
    tail is handled by Pallas boundary-block semantics (padded rows are dropped on
    write-back, so no NaN from garbage rows ever reaches the output).
    """
    n, vocab = x.shape
    assert ew6.shape == (6, vocab)
    if x.dtype != ew6.dtype:
        # MXU operands must share a dtype; counts < 256 are exact in bf16. For peak
        # bandwidth the caller should already provide x in the streaming dtype.
        x = x.astype(ew6.dtype)

    # Batch tile: full batch if small, else a multiple of 8 (ragged tail allowed).
    # At the default tn=256, x buffers are 2 x 256 x ~12928 x 2B ~= 13 MiB: well past
    # the per-step DMA overhead and comfortably inside every generation's VMEM.
    tn = n if n <= tn else (tn // 8) * 8
    grid = (pl.cdiv(n, tn),)

    b2 = fc_bias.reshape(1, 2).astype(jnp.float32)

    return pl.pallas_call(
        dan_kernel,
        out_shape=jax.ShapeDtypeStruct((n, 2), jnp.float32),
        grid_spec=pltpu.PrefetchScalarGridSpec(
            num_scalar_prefetch=0,
            grid=grid,
            in_specs=[
                pl.BlockSpec((tn, vocab), lambda i: (i, 0)),   # x tile (16-bit stream)
                pl.BlockSpec((6, vocab), lambda i: (0, 0)),    # EW hi/lo, lane-dense
                pl.BlockSpec((1, 2), lambda i: (0, 0)),        # bias
            ],
            out_specs=pl.BlockSpec((tn, 2), lambda i: (i, 0)),
        ),
        compiler_params=pltpu.CompilerParams(
            dimension_semantics=("parallel",),     # batch axis; megacore when n/tn >= 2
            vmem_limit_bytes=vmem_limit_bytes,
        ),
    )(x, ew6, b2)


def dan_reference(x, embeds, fc_weight, fc_bias):
    """Pure-JAX mirror of the PyTorch forward (f32, highest matmul precision)."""
    num = jnp.dot(x, embeds, precision=lax.Precision.HIGHEST)
    inv = 1.0 / jnp.sum(x, axis=1, keepdims=True)
    emb = inv * num
    return jnp.dot(emb, fc_weight.T, precision=lax.Precision.HIGHEST) + fc_bias


if __name__ == "__main__":
    # Module-consistent small shapes; the real vocab (12820) is deliberately NOT a
    # multiple of 128, exercising the unpadded full-vocab block path.
    n = 8            # batch of reviews
    vocab = 12820    # module's vocab_size
    emb_dim = 32     # DAN class default embedding_size

    key = jax.random.PRNGKey(0)
    k_emb, k_w, k_b, k_x = jax.random.split(key, 4)

    embeds = jax.random.normal(k_emb, (vocab, emb_dim), dtype=jnp.float32)
    fc_weight = jax.random.normal(k_w, (2, emb_dim), dtype=jnp.float32) * 0.1
    fc_bias = jax.random.normal(k_b, (2,), dtype=jnp.float32) * 0.1

    # Sparse non-negative integer bag-of-words counts with guaranteed nonzero row sums.
    u = jax.random.uniform(k_x, (n, vocab), dtype=jnp.float32)
    counts = jnp.where(u > 0.9, jnp.floor(u * 10.0), 0.0)
    counts = counts.at[:, 0].add(1.0)
    x = counts.astype(jnp.bfloat16)   # exact (integer counts < 256); streamed as bf16

    ew6 = dan_prepare_params(embeds, fc_weight)   # one-time per-model precompute
    out = jax.block_until_ready(dan_forward(x, ew6, fc_bias))

    ref = dan_reference(counts, embeds, fc_weight, fc_bias)
    assert out.shape == (n, 2)
    assert jnp.allclose(out, ref, atol=1e-3, rtol=1e-3), (out, ref)

    print("KERNEL_OK")
</pallas_src>

<mosaic_0001>
module attributes {stable_mosaic.version = 11 : i64} {
  func.func @dan_kernel(%arg0: i32, %arg1: memref<8x12820xbf16, #tpu.memory_space<vmem>>, %arg2: memref<6x12820xbf16, #tpu.memory_space<vmem>>, %arg3: memref<1x2xf32, #tpu.memory_space<vmem>>, %arg4: memref<8x2xf32, #tpu.memory_space<vmem>>) attributes {dimension_semantics = [#tpu.dimension_semantics<parallel>], iteration_bounds = array<i64: 1>, scalar_prefetch = 0 : i64, scratch_operands = 0 : i64, tpu.core_type = #tpu.core_type<tc>, window_params = [{transform_indices = @transform_0, window_bounds = array<i64: 8, 12820>}, {pipeline_mode = #tpu.pipeline_mode<synchronous>, transform_indices = @transform_1, window_bounds = array<i64: 6, 12820>}, {pipeline_mode = #tpu.pipeline_mode<synchronous>, transform_indices = @transform_2, window_bounds = array<i64: 1, 2>}, {transform_indices = @transform_3, window_bounds = array<i64: 8, 2>}]} {
    %c0 = arith.constant 0 : index
    %c0_0 = arith.constant 0 : index
    %0 = vector.load %arg1[%c0, %c0_0] : memref<8x12820xbf16, #tpu.memory_space<vmem>>, vector<8x12820xbf16>
    %c0_1 = arith.constant 0 : index
    %c0_2 = arith.constant 0 : index
    %1 = vector.load %arg2[%c0_1, %c0_2] : memref<6x12820xbf16, #tpu.memory_space<vmem>>, vector<6x12820xbf16>
    %cst = arith.constant dense<0.000000e+00> : vector<8x6xf32>
    %2 = tpu.matmul %0, %1, %cst {dimension_numbers = #tpu.dot_dimension_numbers<[1], [1], [0], [0], [0, 0, 1, 0], [], []>} : vector<8x12820xbf16>, vector<6x12820xbf16>, vector<8x6xf32> -> vector<8x6xf32>
    %3 = vector.extract_strided_slice %2 {offsets = [0, 0], sizes = [8, 3], strides = [1, 1]} : vector<8x6xf32> to vector<8x3xf32>
    %4 = vector.extract_strided_slice %2 {offsets = [0, 3], sizes = [8, 3], strides = [1, 1]} : vector<8x6xf32> to vector<8x3xf32>
    %5 = arith.addf %3, %4 : vector<8x3xf32>
    %6 = vector.extract_strided_slice %5 {offsets = [0, 2], sizes = [8, 1], strides = [1, 1]} : vector<8x3xf32> to vector<8x1xf32>
    %7 = tpu.reciprocal %6 : vector<8x1xf32> -> vector<8x1xf32>
    %8 = vector.extract_strided_slice %5 {offsets = [0, 0], sizes = [8, 2], strides = [1, 1]} : vector<8x3xf32> to vector<8x2xf32>
    %9 = vector.broadcast %7 : vector<8x1xf32> to vector<8x2xf32>
    %10 = arith.mulf %8, %9 : vector<8x2xf32>
    %c0_3 = arith.constant 0 : index
    %c0_4 = arith.constant 0 : index
    %11 = vector.load %arg3[%c0_3, %c0_4] : memref<1x2xf32, #tpu.memory_space<vmem>>, vector<1x2xf32>
    %12 = vector.broadcast %11 : vector<1x2xf32> to vector<8x2xf32>
    %13 = arith.addf %10, %12 : vector<8x2xf32>
    %c0_5 = arith.constant 0 : index
    %c0_6 = arith.constant 0 : index
    %14 = vector.load %arg4[%c0_5, %c0_6] : memref<8x2xf32, #tpu.memory_space<vmem>>, vector<8x2xf32>
    tpu.vector_store %arg4[%c0_5, %c0_6], %13 {strides = array<i32>} : memref<8x2xf32, #tpu.memory_space<vmem>>, vector<8x2xf32>,
    return
  }
  func.func @transform_0(%arg0: i32) -> (i32, i32) {
    %c0_i32 = arith.constant 0 : i32
    %c0_i32_0 = arith.constant 0 : i32
    return %arg0, %c0_i32 : i32, i32
  }
  func.func @transform_1(%arg0: i32) -> (i32, i32) {
    %c0_i32 = arith.constant 0 : i32
    %c0_i32_0 = arith.constant 0 : i32
    %c0_i32_1 = arith.constant 0 : i32
    return %c0_i32, %c0_i32_0 : i32, i32
  }
  func.func @transform_2(%arg0: i32) -> (i32, i32) {
    %c0_i32 = arith.constant 0 : i32
    %c0_i32_0 = arith.constant 0 : i32
    %c0_i32_1 = arith.constant 0 : i32
    return %c0_i32, %c0_i32_0 : i32, i32
  }
  func.func @transform_3(%arg0: i32) -> (i32, i32) {
    %c0_i32 = arith.constant 0 : i32
    %c0_i32_0 = arith.constant 0 : i32
    return %arg0, %c0_i32 : i32, i32
  }
}

</mosaic_0001>

<bundles_post_ra>
// kernel: tpu_custom_call.1
= control target key start
LH: loop header
LB: loop body
LE: loop exit
PB: predicated region body
PF: predicated region fallthrough
CT: control target
= control target key end

     0   :  { %8 = vsyncpa [#allocation3], 0  ;;  %s2308_s0 = inlined_call_operand.hbm [shape: bf16[8,12820], index: 0, kind: input, shape index: {}]   ;;  %s2309_s1 = inlined_call_operand.hbm [shape: bf16[6,12820], index: 1, kind: input, shape index: {}]   ;;  %s2310_s2 = inlined_call_operand.vmem [shape: f32[1,2], index: 2, kind: input, shape index: {}]   ;;  %s2311_s3 = inlined_call_operand.vmem [shape: f32[8,2], index: 3, kind: output, shape index: {}]  }
   0x1   :  { %s15_s14 = sshll.u32 %s2308_s0, 4  ;;  %s16_s14 = int_to_ptr.hbm [resolvable:$true] %s15_s14 }
   0x2   :  { %9 = vsyncpa [#allocation5], 0  ;;  %s2270_s15 = smov [#allocation2]   ;;  %s26_s19 = sshll.u32 %s2309_s1, 4  ;;  %s27_s19 = int_to_ptr.hbm [resolvable:$true] %s26_s19 }
   0x3   :  { %s17_s16 = sshll.u32 %s2270_s15, 4  ;;  %s2271_s20 = smov [#allocation4]   ;;  %s18_s16 = int_to_ptr.vmem [resolvable:$true] %s17_s16 }
   0x4   :  { %20 = dma.hbm_to_vmem [thread:$0]  %s16_s14, 6464, %s18_s16, [#allocation3]  }
   0x5   :  { %s28_s21 = sshll.u32 %s2271_s20, 4  ;;  %s29_s21 = int_to_ptr.vmem [resolvable:$true] %s28_s21 }
   0x6   :  { %31 = dma.hbm_to_vmem [thread:$0]  %s27_s19, 6464, %s29_s21, [#allocation5]  }
   0x7   :  { %2266 = dma.done.wait [#allocation3], 6464  }
   0x8   :  { %2267 = vsyncadd [#allocation3], 4294960832 }
   0x9   :  { %2268 = dma.done.wait [#allocation5], 6464  }
   0xa   :  { %2269 = vsyncadd [#allocation5], 4294960832  ;;  %v94_v0 = vld [vmem:[#allocation4] sm:$0x77]  ;;  %v95_v1 = vld [vmem:[#allocation4 + $0x8] sm:$0x77] }
   0xb   :  { %v549_v2 = vunpack.c.l.b16 %v94_v0  ;;  %v550_v3 = vunpack.c.h.b16 %v94_v0  ;;  %v551_v4 = vunpack.c.l.b16 %v95_v1  ;;  %v552_v5 = vunpack.c.h.b16 %v95_v1  ;;  %v43_v6 = vld [vmem:[#allocation2] sm:$0xff]  ;;  %v44_v7 = vld [vmem:[#allocation2 + $0x8] sm:$0xff]  ;;  %v98_v14 = vld [vmem:[#allocation4 + $0x20] sm:$0x77]  ;;  %s2272_s0 = smov 125  }
   0xc   :  { %v96_v8 = vld [vmem:[#allocation4 + $0x10] sm:$0x77]  ;;  %v97_v9 = vld [vmem:[#allocation4 + $0x18] sm:$0x77]  ;;  %v196_v15 = vunpack.c.l.b16 %v43_v6  ;;  %v197_v16 = vunpack.c.h.b16 %v43_v6  ;;  %v198_v17 = vunpack.c.l.b16 %v44_v7  ;;  %v199_v18 = vunpack.c.h.b16 %v44_v7  ;;  %v99_v24 = vld [vmem:[#allocation4 + $0x28] sm:$0x77] }
   0xd   :  { %v650_v10 = vpack.c.b16 %v549_v2, %v549_v2  ;;  %v651_v11 = vpack.c.b16 %v550_v3, %v550_v3  ;;  %v652_v12 = vpack.c.b16 %v551_v4, %v551_v4  ;;  %v653_v13 = vpack.c.b16 %v552_v5, %v552_v5  ;;  %v45_v40 = vld [vmem:[#allocation2 + $0x10] sm:$0xff]  ;;  %v46_v41 = vld [vmem:[#allocation2 + $0x18] sm:$0xff]  ;;  %v100_v42 = vld [vmem:[#allocation4 + $0x30] sm:$0x77] }
   0xe   :  { %v553_v19 = vunpack.c.l.b16 %v96_v8  ;;  %v555_v20 = vunpack.c.l.b16 %v97_v9  ;;  %v556_v21 = vunpack.c.h.b16 %v97_v9  ;;  %v554_v22 = vunpack.c.h.b16 %v96_v8  ;;  %v101_v43 = vld [vmem:[#allocation4 + $0x38] sm:$0x77]  ;;  %v47_v60 = vld [vmem:[#allocation2 + $0x20] sm:$0xff]  ;;  %v102_v62 = vld [vmem:[#allocation4 + $0x40] sm:$0x77] }
   0xf   :  { %865 = vmatpush.bf16.xpose.msra.mxu0 %v650_v10  ;;  %878 = vmatpush.bf16.xpose.msra.mxu1 %v651_v11  ;;  %v557_v23 = vunpack.c.l.b16 %v98_v14  ;;  %v297_v29 = vpack.c.b16 %v196_v15, %v196_v15  ;;  %v298_v30 = vpack.c.b16 %v197_v16, %v197_v16  ;;  %v299_v31 = vpack.c.b16 %v198_v17, %v198_v17  ;;  %v48_v61 = vld [vmem:[#allocation2 + $0x28] sm:$0xff]  ;;  %v103_v63 = vld [vmem:[#allocation4 + $0x48] sm:$0x77]  ;;  %v49_v16 = vld [vmem:[#allocation2 + $0x30] sm:$0xff] }
  0x10   :  { %891 = vmatpush.bf16.xpose.msra.mxu2 %v652_v12  ;;  %904 = vmatpush.bf16.xpose.msra.mxu3 %v653_v13  ;;  %v654_v25 = vpack.c.b16 %v553_v19, %v553_v19  ;;  %v656_v26 = vpack.c.b16 %v555_v20, %v555_v20  ;;  %v657_v27 = vpack.c.b16 %v556_v21, %v556_v21  ;;  %v559_v33 = vunpack.c.l.b16 %v99_v24  ;;  %v50_v17 = vld [vmem:[#allocation2 + $0x38] sm:$0xff]  ;;  %v105_v19 = vld [vmem:[#allocation4 + $0x58] sm:$0x77] }
  0x11   :  { %v655_v28 = vpack.c.b16 %v554_v22, %v554_v22  ;;  %v300_v32 = vpack.c.b16 %v199_v18, %v199_v18  ;;  %v560_v34 = vunpack.c.h.b16 %v99_v24  ;;  %v558_v35 = vunpack.c.h.b16 %v98_v14  ;;  %v104_v18 = vld [vmem:[#allocation4 + $0x50] sm:$0x77] }
  0x12   :  { %v658_v36 = vpack.c.b16 %v557_v23, %v557_v23  ;;  %v660_v37 = vpack.c.b16 %v559_v33, %v559_v33  ;;  %v200_v44 = vunpack.c.l.b16 %v45_v40  ;;  %v201_v45 = vunpack.c.h.b16 %v45_v40 }
  0x13   :  { %v661_v38 = vpack.c.b16 %v560_v34, %v560_v34  ;;  %v659_v39 = vpack.c.b16 %v558_v35, %v558_v35  ;;  %v202_v46 = vunpack.c.l.b16 %v46_v41  ;;  %v203_v47 = vunpack.c.h.b16 %v46_v41 }
  0x14   :  { %v561_v48 = vunpack.c.l.b16 %v100_v42  ;;  %v563_v49 = vunpack.c.l.b16 %v101_v43  ;;  %v564_v50 = vunpack.c.h.b16 %v101_v43  ;;  %v562_v51 = vunpack.c.h.b16 %v100_v42 }
  0x15   :  { %v301_v52 = vpack.c.b16 %v200_v44, %v200_v44  ;;  %v302_v53 = vpack.c.b16 %v201_v45, %v201_v45  ;;  %v303_v54 = vpack.c.b16 %v202_v46, %v202_v46  ;;  %v304_v55 = vpack.c.b16 %v203_v47, %v203_v47 }
  0x16   :  { %866 = vmatmul.bf16.vlgmr.msra.gmra.mxu0 %v297_v29  ;;  %879 = vmatmul.bf16.vlgmr.msra.gmra.mxu1 %v298_v30  ;;  %v662_v56 = vpack.c.b16 %v561_v48, %v561_v48  ;;  %v664_v57 = vpack.c.b16 %v563_v49, %v563_v49  ;;  %v665_v58 = vpack.c.b16 %v564_v50, %v564_v50  ;;  %v204_v0 = vunpack.c.l.b16 %v47_v60 }
  0x17   :  { %917 = vmatpush.bf16.xpose.msrb.mxu0 %v654_v25  ;;  %930 = vmatpush.bf16.xpose.msrb.mxu1 %v655_v28  ;;  %v663_v59 = vpack.c.b16 %v562_v51, %v562_v51  ;;  %v205_v1 = vunpack.c.h.b16 %v47_v60  ;;  %v206_v2 = vunpack.c.l.b16 %v48_v61  ;;  %v207_v3 = vunpack.c.h.b16 %v48_v61 }
  0x18   :  { %943 = vmatpush.bf16.xpose.msrb.mxu2 %v656_v26  ;;  %956 = vmatpush.bf16.xpose.msrb.mxu3 %v657_v27  ;;  %v565_v4 = vunpack.c.l.b16 %v102_v62  ;;  %v567_v5 = vunpack.c.l.b16 %v103_v63  ;;  %v568_v6 = vunpack.c.h.b16 %v103_v63  ;;  %v566_v7 = vunpack.c.h.b16 %v102_v62 }
  0x19   :  { %892 = vmatmul.bf16.vlgmr.msra.gmra.mxu2 %v299_v31  ;;  %905 = vmatmul.bf16.vlgmr.msra.gmra.mxu3 %v300_v32  ;;  %v305_v8 = vpack.c.b16 %v204_v0, %v204_v0  ;;  %v306_v9 = vpack.c.b16 %v205_v1, %v205_v1  ;;  %v307_v10 = vpack.c.b16 %v206_v2, %v206_v2  ;;  %v208_v20 = vunpack.c.l.b16 %v49_v16 }
  0x1a   :  { %v308_v11 = vpack.c.b16 %v207_v3, %v207_v3  ;;  %v666_v12 = vpack.c.b16 %v565_v4, %v565_v4  ;;  %v668_v13 = vpack.c.b16 %v567_v5, %v567_v5  ;;  %v669_v14 = vpack.c.b16 %v568_v6, %v568_v6 }
  0x1b   :  { %v667_v15 = vpack.c.b16 %v566_v7, %v566_v7  ;;  %v209_v21 = vunpack.c.h.b16 %v49_v16  ;;  %v210_v22 = vunpack.c.l.b16 %v50_v17  ;;  %v211_v23 = vunpack.c.h.b16 %v50_v17 }
  0x1c   :  { %v569_v24 = vunpack.c.l.b16 %v104_v18  ;;  %v571_v25 = vunpack.c.l.b16 %v105_v19  ;;  %v572_v26 = vunpack.c.h.b16 %v105_v19  ;;  %v570_v27 = vunpack.c.h.b16 %v104_v18 }
  0x1d   :  { %v309_v28 = vpack.c.b16 %v208_v20, %v208_v20  ;;  %v310_v29 = vpack.c.b16 %v209_v21, %v209_v21  ;;  %v311_v30 = vpack.c.b16 %v210_v22, %v210_v22  ;;  %v312_v31 = vpack.c.b16 %v211_v23, %v211_v23 }
  0x1e   :  { %v670_v32 = vpack.c.b16 %v569_v24, %v569_v24  ;;  %v672_v33 = vpack.c.b16 %v571_v25, %v571_v25  ;;  %v673_v34 = vpack.c.b16 %v572_v26, %v572_v26  ;;  %v671_v35 = vpack.c.b16 %v570_v27, %v570_v27 }
  0x1f   :  { %969 = vmatpush.bf16.xpose.msra.mxu0 %v658_v36  ;;  %982 = vmatpush.bf16.xpose.msra.mxu1 %v659_v39  ;;  %v51_v36 = vld [vmem:[#allocation2 + $0x40] sm:$0xff]  ;;  %vm851_vm0 = vcmask 162816   ;;  %vm2201_vm5 = vcmask 15360  }
  0x20   :  { %995 = vmatpush.bf16.xpose.msra.mxu2 %v660_v37  ;;  %1008 = vmatpush.bf16.xpose.msra.mxu3 %v661_v38  ;;  %v52_v37 = vld [vmem:[#allocation2 + $0x48] sm:$0xff]  ;;  %v106_v38 = vld [vmem:[#allocation4 + $0x60] sm:$0x77]  ;;  %v107_v39 = vld [vmem:[#allocation4 + $0x68] sm:$0x77]  ;;  %v212_v40 = vunpack.c.l.b16 %v51_v36  ;;  %v213_v41 = vunpack.c.h.b16 %v51_v36 }
  0x21   :  { %v214_v42 = vunpack.c.l.b16 %v52_v37  ;;  %v215_v43 = vunpack.c.h.b16 %v52_v37  ;;  %v573_v44 = vunpack.c.l.b16 %v106_v38  ;;  %v575_v45 = vunpack.c.l.b16 %v107_v39 }
  0x22   :  { %v576_v46 = vunpack.c.h.b16 %v107_v39  ;;  %v574_v47 = vunpack.c.h.b16 %v106_v38  ;;  %v313_v48 = vpack.c.b16 %v212_v40, %v212_v40  ;;  %v314_v49 = vpack.c.b16 %v213_v41, %v213_v41 }
  0x23   :  { %v315_v50 = vpack.c.b16 %v214_v42, %v214_v42  ;;  %v316_v51 = vpack.c.b16 %v215_v43, %v215_v43 }
  0x26   :  { %918 = vmatmul.bf16.vlgmr.msrb.gmra.mxu0 %v301_v52  ;;  %931 = vmatmul.bf16.vlgmr.msrb.gmra.mxu1 %v302_v53  ;;  %v674_v52 = vpack.c.b16 %v573_v44, %v573_v44  ;;  %v676_v53 = vpack.c.b16 %v575_v45, %v575_v45 }
  0x27   :  { %1021 = vmatpush.bf16.xpose.msrb.mxu0 %v662_v56  ;;  %1034 = vmatpush.bf16.xpose.msrb.mxu1 %v663_v59  ;;  %v53_v56 = vld [vmem:[#allocation2 + $0x50] sm:$0xff] }
  0x28   :  { %v109_v59 = vld [vmem:[#allocation4 + $0x78] sm:$0x77]  ;;  %v216_v60 = vunpack.c.l.b16 %v53_v56  ;;  %v217_v61 = vunpack.c.h.b16 %v53_v56 }
  0x29   :  { %944 = vmatmul.bf16.vlgmr.msrb.gmra.mxu2 %v303_v54  ;;  %957 = vmatmul.bf16.vlgmr.msrb.gmra.mxu3 %v304_v55  ;;  %v677_v54 = vpack.c.b16 %v576_v46, %v576_v46  ;;  %v675_v55 = vpack.c.b16 %v574_v47, %v574_v47  ;;  %v579_v1 = vunpack.c.l.b16 %v109_v59  ;;  %v580_v2 = vunpack.c.h.b16 %v109_v59 }
  0x2a   :  { %1047 = vmatpush.bf16.xpose.msrb.mxu2 %v664_v57  ;;  %1060 = vmatpush.bf16.xpose.msrb.mxu3 %v665_v58  ;;  %v54_v57 = vld [vmem:[#allocation2 + $0x58] sm:$0xff]  ;;  %v108_v58 = vld [vmem:[#allocation4 + $0x70] sm:$0x77]  ;;  %v317_v4 = vpack.c.b16 %v216_v60, %v216_v60  ;;  %v318_v5 = vpack.c.b16 %v217_v61, %v217_v61 }
  0x2b   :  { %v218_v62 = vunpack.c.l.b16 %v54_v57  ;;  %v219_v63 = vunpack.c.h.b16 %v54_v57  ;;  %v577_v0 = vunpack.c.l.b16 %v108_v58  ;;  %v578_v3 = vunpack.c.h.b16 %v108_v58 }
  0x2d   :  { %v319_v6 = vpack.c.b16 %v218_v62, %v218_v62  ;;  %v320_v7 = vpack.c.b16 %v219_v63, %v219_v63 }
  0x36   :  { %970 = vmatmul.bf16.vlgmr.msra.gmra.mxu0 %v305_v8  ;;  %983 = vmatmul.bf16.vlgmr.msra.gmra.mxu1 %v306_v9  ;;  %v678_v8 = vpack.c.b16 %v577_v0, %v577_v0  ;;  %v680_v9 = vpack.c.b16 %v579_v1, %v579_v1 }
  0x37   :  { %1073 = vmatpush.bf16.xpose.msra.mxu0 %v666_v12  ;;  %1086 = vmatpush.bf16.xpose.msra.mxu1 %v667_v15  ;;  %v55_v12 = vld [vmem:[#allocation2 + $0x60] sm:$0xff] }
  0x38   :  { %v111_v15 = vld [vmem:[#allocation4 + $0x88] sm:$0x77]  ;;  %v220_v16 = vunpack.c.l.b16 %v55_v12  ;;  %v221_v17 = vunpack.c.h.b16 %v55_v12 }
  0x39   :  { %996 = vmatmul.bf16.vlgmr.msra.gmra.mxu2 %v307_v10  ;;  %1009 = vmatmul.bf16.vlgmr.msra.gmra.mxu3 %v308_v11  ;;  %v681_v10 = vpack.c.b16 %v580_v2, %v580_v2  ;;  %v679_v11 = vpack.c.b16 %v578_v3, %v578_v3  ;;  %v583_v21 = vunpack.c.l.b16 %v111_v15  ;;  %v584_v22 = vunpack.c.h.b16 %v111_v15 }
  0x3a   :  { %1099 = vmatpush.bf16.xpose.msra.mxu2 %v668_v13  ;;  %1112 = vmatpush.bf16.xpose.msra.mxu3 %v669_v14  ;;  %v56_v13 = vld [vmem:[#allocation2 + $0x68] sm:$0xff]  ;;  %v110_v14 = vld [vmem:[#allocation4 + $0x80] sm:$0x77]  ;;  %v321_v24 = vpack.c.b16 %v220_v16, %v220_v16  ;;  %v322_v25 = vpack.c.b16 %v221_v17, %v221_v17 }
  0x3b   :  { %v222_v18 = vunpack.c.l.b16 %v56_v13  ;;  %v223_v19 = vunpack.c.h.b16 %v56_v13  ;;  %v581_v20 = vunpack.c.l.b16 %v110_v14  ;;  %v582_v23 = vunpack.c.h.b16 %v110_v14  ;;  %v61_v16 = vld [vmem:[#allocation2 + $0x90] sm:$0xff]  ;;  %v62_v17 = vld [vmem:[#allocation2 + $0x98] sm:$0xff] }
  0x3d   :  { %v323_v26 = vpack.c.b16 %v222_v18, %v222_v18  ;;  %v324_v27 = vpack.c.b16 %v223_v19, %v223_v19  ;;  %v116_v19 = vld [vmem:[#allocation4 + $0xb0] sm:$0x77] }
  0x46   :  { %1022 = vmatmul.bf16.vlgmr.msrb.gmra.mxu0 %v309_v28  ;;  %1035 = vmatmul.bf16.vlgmr.msrb.gmra.mxu1 %v310_v29  ;;  %v682_v28 = vpack.c.b16 %v581_v20, %v581_v20  ;;  %v684_v29 = vpack.c.b16 %v583_v21, %v583_v21  ;;  %v117_v20 = vld [vmem:[#allocation4 + $0xb8] sm:$0x77]  ;;  %v232_v21 = vunpack.c.l.b16 %v61_v16 }
  0x47   :  { %1125 = vmatpush.bf16.xpose.msrb.mxu0 %v670_v32  ;;  %1138 = vmatpush.bf16.xpose.msrb.mxu1 %v671_v35  ;;  %v57_v32 = vld [vmem:[#allocation2 + $0x70] sm:$0xff] }
  0x48   :  { %v113_v35 = vld [vmem:[#allocation4 + $0x98] sm:$0x77]  ;;  %v224_v36 = vunpack.c.l.b16 %v57_v32  ;;  %v225_v37 = vunpack.c.h.b16 %v57_v32 }
  0x49   :  { %1048 = vmatmul.bf16.vlgmr.msrb.gmra.mxu2 %v311_v30  ;;  %1061 = vmatmul.bf16.vlgmr.msrb.gmra.mxu3 %v312_v31  ;;  %v685_v30 = vpack.c.b16 %v584_v22, %v584_v22  ;;  %v683_v31 = vpack.c.b16 %v582_v23, %v582_v23  ;;  %v587_v41 = vunpack.c.l.b16 %v113_v35  ;;  %v588_v42 = vunpack.c.h.b16 %v113_v35 }
  0x4a   :  { %1151 = vmatpush.bf16.xpose.msrb.mxu2 %v672_v33  ;;  %1164 = vmatpush.bf16.xpose.msrb.mxu3 %v673_v34  ;;  %v58_v33 = vld [vmem:[#allocation2 + $0x78] sm:$0xff]  ;;  %v112_v34 = vld [vmem:[#allocation4 + $0x90] sm:$0x77]  ;;  %v325_v44 = vpack.c.b16 %v224_v36, %v224_v36  ;;  %v326_v45 = vpack.c.b16 %v225_v37, %v225_v37  ;;  %v233_v22 = vunpack.c.h.b16 %v61_v16  ;;  %v234_v23 = vunpack.c.l.b16 %v62_v17  ;;  %v65_v16 = vld [vmem:[#allocation2 + $0xb0] sm:$0xff] }
  0x4b   :  { %v226_v38 = vunpack.c.l.b16 %v58_v33  ;;  %v227_v39 = vunpack.c.h.b16 %v58_v33  ;;  %v585_v40 = vunpack.c.l.b16 %v112_v34  ;;  %v586_v43 = vunpack.c.h.b16 %v112_v34 }
  0x4c   :  { %v334_v32 = vpack.c.b16 %v233_v22, %v233_v22  ;;  %v335_v35 = vpack.c.b16 %v234_v23, %v234_v23  ;;  %v241_v22 = vunpack.c.h.b16 %v65_v16 }
  0x4d   :  { %v327_v46 = vpack.c.b16 %v226_v38, %v226_v38  ;;  %v328_v47 = vpack.c.b16 %v227_v39, %v227_v39 }
  0x56   :  { %1074 = vmatmul.bf16.vlgmr.msra.gmra.mxu0 %v313_v48  ;;  %1087 = vmatmul.bf16.vlgmr.msra.gmra.mxu1 %v314_v49  ;;  %v686_v48 = vpack.c.b16 %v585_v40, %v585_v40  ;;  %v688_v49 = vpack.c.b16 %v587_v41, %v587_v41 }
  0x57   :  { %1177 = vmatpush.bf16.xpose.msra.mxu0 %v674_v52  ;;  %1190 = vmatpush.bf16.xpose.msra.mxu1 %v675_v55  ;;  %v59_v52 = vld [vmem:[#allocation2 + $0x80] sm:$0xff] }
  0x58   :  { %v115_v55 = vld [vmem:[#allocation4 + $0xa8] sm:$0x77]  ;;  %v228_v56 = vunpack.c.l.b16 %v59_v52  ;;  %v229_v57 = vunpack.c.h.b16 %v59_v52 }
  0x59   :  { %1100 = vmatmul.bf16.vlgmr.msra.gmra.mxu2 %v315_v50  ;;  %1113 = vmatmul.bf16.vlgmr.msra.gmra.mxu3 %v316_v51  ;;  %v689_v50 = vpack.c.b16 %v588_v42, %v588_v42  ;;  %v687_v51 = vpack.c.b16 %v586_v43, %v586_v43  ;;  %v591_v61 = vunpack.c.l.b16 %v115_v55  ;;  %v592_v62 = vunpack.c.h.b16 %v115_v55  ;;  %v119_v52 = vld [vmem:[#allocation4 + $0xc8] sm:$0x77] }
  0x5a   :  { %1203 = vmatpush.bf16.xpose.msra.mxu2 %v676_v53  ;;  %1216 = vmatpush.bf16.xpose.msra.mxu3 %v677_v54  ;;  %v60_v53 = vld [vmem:[#allocation2 + $0x88] sm:$0xff]  ;;  %v114_v54 = vld [vmem:[#allocation4 + $0xa0] sm:$0x77]  ;;  %v329_v0 = vpack.c.b16 %v228_v56, %v228_v56  ;;  %v330_v1 = vpack.c.b16 %v229_v57, %v229_v57 }
  0x5b   :  { %v230_v58 = vunpack.c.l.b16 %v60_v53  ;;  %v231_v59 = vunpack.c.h.b16 %v60_v53  ;;  %v589_v60 = vunpack.c.l.b16 %v114_v54  ;;  %v590_v63 = vunpack.c.h.b16 %v114_v54 }
  0x66   :  { %1126 = vmatmul.bf16.vlgmr.msrb.gmra.mxu0 %v317_v4  ;;  %1139 = vmatmul.bf16.vlgmr.msrb.gmra.mxu1 %v318_v5  ;;  %v331_v4 = vpack.c.b16 %v230_v58, %v230_v58  ;;  %v332_v5 = vpack.c.b16 %v231_v59, %v231_v59  ;;  %v599_v58 = vunpack.c.l.b16 %v119_v52  ;;  %v600_v59 = vunpack.c.h.b16 %v119_v52  ;;  %v123_v52 = vld [vmem:[#allocation4 + $0xe8] sm:$0x77] }
  0x67   :  { %1229 = vmatpush.bf16.xpose.msrb.mxu0 %v678_v8  ;;  %1242 = vmatpush.bf16.xpose.msrb.mxu1 %v679_v11  ;;  %v692_v8 = vpack.c.b16 %v591_v61, %v591_v61 }
  0x69   :  { %1152 = vmatmul.bf16.vlgmr.msrb.gmra.mxu2 %v319_v6  ;;  %1165 = vmatmul.bf16.vlgmr.msrb.gmra.mxu3 %v320_v7  ;;  %v690_v7 = vpack.c.b16 %v589_v60, %v589_v60 }
  0x6a   :  { %1255 = vmatpush.bf16.xpose.msrb.mxu2 %v680_v9  ;;  %1268 = vmatpush.bf16.xpose.msrb.mxu3 %v681_v10  ;;  %v693_v9 = vpack.c.b16 %v592_v62, %v592_v62  ;;  %v691_v10 = vpack.c.b16 %v590_v63, %v590_v63 }
  0x76   :  { %1178 = vmatmul.bf16.vlgmr.msra.gmra.mxu0 %v321_v24  ;;  %1191 = vmatmul.bf16.vlgmr.msra.gmra.mxu1 %v322_v25  ;;  %v235_v24 = vunpack.c.h.b16 %v62_v17  ;;  %v593_v25 = vunpack.c.l.b16 %v116_v19  ;;  %v66_v17 = vld [vmem:[#allocation2 + $0xb8] sm:$0xff] }
  0x77   :  { %1281 = vmatpush.bf16.xpose.msra.mxu0 %v682_v28  ;;  %1294 = vmatpush.bf16.xpose.msra.mxu1 %v683_v31  ;;  %v594_v28 = vunpack.c.h.b16 %v116_v19  ;;  %v333_v31 = vpack.c.b16 %v232_v21, %v232_v21  ;;  %v120_v19 = vld [vmem:[#allocation4 + $0xd0] sm:$0x77]  ;;  %v240_v21 = vunpack.c.l.b16 %v65_v16  ;;  %v242_v23 = vunpack.c.l.b16 %v66_v17  ;;  %v69_v16 = vld [vmem:[#allocation2 + $0xd0] sm:$0xff] }
  0x78   :  { %v336_v36 = vpack.c.b16 %v235_v24, %v235_v24  ;;  %v694_v38 = vpack.c.b16 %v593_v25, %v593_v25  ;;  %v243_v24 = vunpack.c.h.b16 %v66_v17  ;;  %v601_v25 = vunpack.c.l.b16 %v120_v19  ;;  %v70_v17 = vld [vmem:[#allocation2 + $0xd8] sm:$0xff] }
  0x79   :  { %1204 = vmatmul.bf16.vlgmr.msra.gmra.mxu2 %v323_v26  ;;  %1217 = vmatmul.bf16.vlgmr.msra.gmra.mxu3 %v324_v27  ;;  %v595_v26 = vunpack.c.l.b16 %v117_v20  ;;  %v596_v27 = vunpack.c.h.b16 %v117_v20  ;;  %v695_v41 = vpack.c.b16 %v594_v28, %v594_v28  ;;  %v121_v20 = vld [vmem:[#allocation4 + $0xd8] sm:$0x77]  ;;  %v602_v28 = vunpack.c.h.b16 %v120_v19  ;;  %v124_v19 = vld [vmem:[#allocation4 + $0xf0] sm:$0x77] }
  0x7a   :  { %1307 = vmatpush.bf16.xpose.msra.mxu2 %v684_v29  ;;  %1320 = vmatpush.bf16.xpose.msra.mxu3 %v685_v30 }
  0x7b   :  { %v696_v39 = vpack.c.b16 %v595_v26, %v595_v26  ;;  %v697_v40 = vpack.c.b16 %v596_v27, %v596_v27  ;;  %v603_v26 = vunpack.c.l.b16 %v121_v20  ;;  %v604_v27 = vunpack.c.h.b16 %v121_v20  ;;  %v125_v20 = vld [vmem:[#allocation4 + $0xf8] sm:$0x77] }
  0x86   :  { %1230 = vmatmul.bf16.vlgmr.msrb.gmra.mxu0 %v325_v44  ;;  %1243 = vmatmul.bf16.vlgmr.msrb.gmra.mxu1 %v326_v45 }
  0x87   :  { %1333 = vmatpush.bf16.xpose.msrb.mxu0 %v686_v48  ;;  %1346 = vmatpush.bf16.xpose.msrb.mxu1 %v687_v51  ;;  %v63_v48 = vld [vmem:[#allocation2 + $0xa0] sm:$0xff]  ;;  %v118_v51 = vld [vmem:[#allocation4 + $0xc0] sm:$0x77] }
  0x88   :  { %v236_v53 = vunpack.c.l.b16 %v63_v48  ;;  %v237_v54 = vunpack.c.h.b16 %v63_v48  ;;  %v597_v57 = vunpack.c.l.b16 %v118_v51  ;;  %v598_v60 = vunpack.c.h.b16 %v118_v51  ;;  %v67_v48 = vld [vmem:[#allocation2 + $0xc0] sm:$0xff]  ;;  %v122_v51 = vld [vmem:[#allocation4 + $0xe0] sm:$0x77] }
  0x89   :  { %1256 = vmatmul.bf16.vlgmr.msrb.gmra.mxu2 %v327_v46  ;;  %1269 = vmatmul.bf16.vlgmr.msrb.gmra.mxu3 %v328_v47 }
  0x8a   :  { %1359 = vmatpush.bf16.xpose.msrb.mxu2 %v688_v49  ;;  %1372 = vmatpush.bf16.xpose.msrb.mxu3 %v689_v50  ;;  %v64_v49 = vld [vmem:[#allocation2 + $0xa8] sm:$0xff]  ;;  %v337_v63 = vpack.c.b16 %v236_v53, %v236_v53  ;;  %v244_v53 = vunpack.c.l.b16 %v67_v48 }
  0x8b   :  { %v238_v55 = vunpack.c.l.b16 %v64_v49  ;;  %v239_v56 = vunpack.c.h.b16 %v64_v49  ;;  %v68_v49 = vld [vmem:[#allocation2 + $0xc8] sm:$0xff] }
  0x93   :  { %v867_v2 = vpop.f32.mrf.mxu0  ;;  %v880_v3 = vpop.f32.mrf.mxu1 }
  0x94   :  { %v881_v6 = vadd.f32 %v880_v3, %v867_v2  ;;  %v339_v3 = vpack.c.b16 %v238_v55, %v238_v55  ;;  %v246_v55 = vunpack.c.l.b16 %v68_v49 }
  0x96   :  { %1282 = vmatmul.bf16.vlgmr.msra.gmra.mxu0 %v329_v0  ;;  %1295 = vmatmul.bf16.vlgmr.msra.gmra.mxu1 %v330_v1  ;;  %v338_v0 = vpack.c.b16 %v237_v54, %v237_v54  ;;  %v245_v54 = vunpack.c.h.b16 %v67_v48  ;;  %v71_v48 = vld [vmem:[#allocation2 + $0xe0] sm:$0xff] }
  0x97   :  { %1385 = vmatpush.bf16.xpose.msra.mxu0 %v690_v7  ;;  %1398 = vmatpush.bf16.xpose.msra.mxu1 %v691_v10  ;;  %v700_v7 = vpack.c.b16 %v599_v58, %v599_v58  ;;  %v607_v58 = vunpack.c.l.b16 %v123_v52 }
  0x99   :  { %1308 = vmatmul.bf16.vlgmr.msra.gmra.mxu2 %v331_v4  ;;  %1321 = vmatmul.bf16.vlgmr.msra.gmra.mxu3 %v332_v5  ;;  %v340_v4 = vpack.c.b16 %v239_v56, %v239_v56  ;;  %v247_v56 = vunpack.c.h.b16 %v68_v49  ;;  %v72_v49 = vld [vmem:[#allocation2 + $0xe8] sm:$0xff] }
  0x9a   :  { %1411 = vmatpush.bf16.xpose.msra.mxu2 %v692_v8  ;;  %1424 = vmatpush.bf16.xpose.msra.mxu3 %v693_v9  ;;  %v701_v8 = vpack.c.b16 %v600_v59, %v600_v59  ;;  %v699_v9 = vpack.c.b16 %v598_v60, %v598_v60  ;;  %v608_v59 = vunpack.c.h.b16 %v123_v52  ;;  %v606_v60 = vunpack.c.h.b16 %v122_v51  ;;  %v127_v52 = vld [vmem:[#allocation4 + $0x108] sm:$0x77] }
  0x9b   :  { %v869_v14 = vpop.f32.mrf.mxu0  ;;  %v882_v15 = vpop.f32.mrf.mxu1 }
  0x9c   :  { %v893_v11 = vpop.f32.mrf.mxu2  ;;  %v906_v12 = vpop.f32.mrf.mxu3 }
  0x9d   :  { %v894_v13 = vadd.f32 %v893_v11, %v881_v6  ;;  %v698_v6 = vpack.c.b16 %v597_v57, %v597_v57  ;;  %v605_v57 = vunpack.c.l.b16 %v122_v51  ;;  %v126_v51 = vld [vmem:[#allocation4 + $0x100] sm:$0x77] }
  0x9f   :  { %v907_v18 = vadd.f32 %v906_v12, %v894_v13 }
  0xa3   :  { %v919_v33 = vpop.f32.mrf.mxu0  ;;  %v932_v34 = vpop.f32.mrf.mxu1 }
  0xa4   :  { %v895_v29 = vpop.f32.mrf.mxu2  ;;  %v908_v30 = vpop.f32.mrf.mxu3  ;;  %v920_v37 = vadd.f32 %v919_v33, %v907_v18 }
  0xa6   :  { %v933_v42 = vadd.f32 %v932_v34, %v920_v37  ;;  %1334 = vmatmul.bf16.vlgmr.msrb.gmra.mxu0 %v333_v31  ;;  %1347 = vmatmul.bf16.vlgmr.msrb.gmra.mxu1 %v334_v32  ;;  %v341_v31 = vpack.c.b16 %v240_v21, %v240_v21  ;;  %v342_v32 = vpack.c.b16 %v241_v22, %v241_v22  ;;  %v248_v21 = vunpack.c.l.b16 %v69_v16 }
  0xa7   :  { %1437 = vmatpush.bf16.xpose.msrb.mxu0 %v694_v38  ;;  %1450 = vmatpush.bf16.xpose.msrb.mxu1 %v695_v41  ;;  %v702_v38 = vpack.c.b16 %v601_v25, %v601_v25  ;;  %v703_v41 = vpack.c.b16 %v602_v28, %v602_v28  ;;  %v249_v22 = vunpack.c.h.b16 %v69_v16  ;;  %v609_v25 = vunpack.c.l.b16 %v124_v19  ;;  %v73_v16 = vld [vmem:[#allocation2 + $0xf0] sm:$0xff] }
  0xa8   :  { %v610_v28 = vunpack.c.h.b16 %v124_v19  ;;  %v128_v19 = vld [vmem:[#allocation4 + $0x110] sm:$0x77] }
  0xa9   :  { %1360 = vmatmul.bf16.vlgmr.msrb.gmra.mxu2 %v335_v35  ;;  %1373 = vmatmul.bf16.vlgmr.msrb.gmra.mxu3 %v336_v36  ;;  %v343_v35 = vpack.c.b16 %v242_v23, %v242_v23  ;;  %v344_v36 = vpack.c.b16 %v243_v24, %v243_v24  ;;  %v250_v23 = vunpack.c.l.b16 %v70_v17  ;;  %v251_v24 = vunpack.c.h.b16 %v70_v17  ;;  %v74_v17 = vld [vmem:[#allocation2 + $0xf8] sm:$0xff] }
  0xaa   :  { %1463 = vmatpush.bf16.xpose.msrb.mxu2 %v696_v39  ;;  %1476 = vmatpush.bf16.xpose.msrb.mxu3 %v697_v40  ;;  %v704_v39 = vpack.c.b16 %v603_v26, %v603_v26  ;;  %v705_v40 = vpack.c.b16 %v604_v27, %v604_v27  ;;  %v611_v26 = vunpack.c.l.b16 %v125_v20  ;;  %v612_v27 = vunpack.c.h.b16 %v125_v20  ;;  %v129_v20 = vld [vmem:[#allocation4 + $0x118] sm:$0x77] }
  0xab   :  { %v921_v46 = vpop.f32.mrf.mxu0  ;;  %v934_v47 = vpop.f32.mrf.mxu1 }
  0xac   :  { %v945_v43 = vpop.f32.mrf.mxu2  ;;  %v958_v44 = vpop.f32.mrf.mxu3 }
  0xad   :  { %v946_v45 = vadd.f32 %v945_v43, %v933_v42 }
  0xaf   :  { %v959_v50 = vadd.f32 %v958_v44, %v946_v45 }
  0xb3   :  { %v971_v1 = vpop.f32.mrf.mxu0  ;;  %v984_v2 = vpop.f32.mrf.mxu1 }
  0xb4   :  { %v947_v61 = vpop.f32.mrf.mxu2  ;;  %v960_v62 = vpop.f32.mrf.mxu3  ;;  %v972_v5 = vadd.f32 %v971_v1, %v959_v50 }
  0xb6   :  { %v985_v10 = vadd.f32 %v984_v2, %v972_v5  ;;  %1386 = vmatmul.bf16.vlgmr.msra.gmra.mxu0 %v337_v63  ;;  %1399 = vmatmul.bf16.vlgmr.msra.gmra.mxu1 %v338_v0  ;;  %v345_v63 = vpack.c.b16 %v244_v53, %v244_v53  ;;  %v346_v0 = vpack.c.b16 %v245_v54, %v245_v54  ;;  %v252_v53 = vunpack.c.l.b16 %v71_v48 }
  0xb7   :  { %1489 = vmatpush.bf16.xpose.msra.mxu0 %v698_v6  ;;  %1502 = vmatpush.bf16.xpose.msra.mxu1 %v699_v9  ;;  %v706_v6 = vpack.c.b16 %v605_v57, %v605_v57  ;;  %v707_v9 = vpack.c.b16 %v606_v60, %v606_v60  ;;  %v253_v54 = vunpack.c.h.b16 %v71_v48  ;;  %v613_v57 = vunpack.c.l.b16 %v126_v51  ;;  %v75_v48 = vld [vmem:[#allocation2 + $0x100] sm:$0xff] }
  0xb8   :  { %v614_v60 = vunpack.c.h.b16 %v126_v51  ;;  %v130_v51 = vld [vmem:[#allocation4 + $0x120] sm:$0x77] }
  0xb9   :  { %1412 = vmatmul.bf16.vlgmr.msra.gmra.mxu2 %v339_v3  ;;  %1425 = vmatmul.bf16.vlgmr.msra.gmra.mxu3 %v340_v4  ;;  %v347_v3 = vpack.c.b16 %v246_v55, %v246_v55  ;;  %v348_v4 = vpack.c.b16 %v247_v56, %v247_v56  ;;  %v254_v55 = vunpack.c.l.b16 %v72_v49  ;;  %v255_v56 = vunpack.c.h.b16 %v72_v49  ;;  %v76_v49 = vld [vmem:[#allocation2 + $0x108] sm:$0xff] }
  0xba   :  { %1515 = vmatpush.bf16.xpose.msra.mxu2 %v700_v7  ;;  %1528 = vmatpush.bf16.xpose.msra.mxu3 %v701_v8  ;;  %v708_v7 = vpack.c.b16 %v607_v58, %v607_v58  ;;  %v709_v8 = vpack.c.b16 %v608_v59, %v608_v59  ;;  %v615_v58 = vunpack.c.l.b16 %v127_v52  ;;  %v616_v59 = vunpack.c.h.b16 %v127_v52  ;;  %v131_v52 = vld [vmem:[#allocation4 + $0x128] sm:$0x77] }
  0xbb   :  { %v973_v14 = vpop.f32.mrf.mxu0  ;;  %v986_v15 = vpop.f32.mrf.mxu1 }
  0xbc   :  { %v997_v11 = vpop.f32.mrf.mxu2  ;;  %v1010_v12 = vpop.f32.mrf.mxu3 }
  0xbd   :  { %v998_v13 = vadd.f32 %v997_v11, %v985_v10 }
  0xbf   :  { %v1011_v18 = vadd.f32 %v1010_v12, %v998_v13 }
  0xc3   :  { %v1023_v33 = vpop.f32.mrf.mxu0  ;;  %v1036_v34 = vpop.f32.mrf.mxu1 }
  0xc4   :  { %v999_v29 = vpop.f32.mrf.mxu2  ;;  %v1012_v30 = vpop.f32.mrf.mxu3  ;;  %v1024_v37 = vadd.f32 %v1023_v33, %v1011_v18 }
  0xc6   :  { %v1037_v42 = vadd.f32 %v1036_v34, %v1024_v37  ;;  %1438 = vmatmul.bf16.vlgmr.msrb.gmra.mxu0 %v341_v31  ;;  %1451 = vmatmul.bf16.vlgmr.msrb.gmra.mxu1 %v342_v32  ;;  %v349_v31 = vpack.c.b16 %v248_v21, %v248_v21  ;;  %v350_v32 = vpack.c.b16 %v249_v22, %v249_v22  ;;  %v256_v21 = vunpack.c.l.b16 %v73_v16 }
  0xc7   :  { %1541 = vmatpush.bf16.xpose.msrb.mxu0 %v702_v38  ;;  %1554 = vmatpush.bf16.xpose.msrb.mxu1 %v703_v41  ;;  %v710_v38 = vpack.c.b16 %v609_v25, %v609_v25  ;;  %v711_v41 = vpack.c.b16 %v610_v28, %v610_v28  ;;  %v257_v22 = vunpack.c.h.b16 %v73_v16  ;;  %v617_v25 = vunpack.c.l.b16 %v128_v19  ;;  %v77_v16 = vld [vmem:[#allocation2 + $0x110] sm:$0xff] }
  0xc8   :  { %v618_v28 = vunpack.c.h.b16 %v128_v19  ;;  %v132_v19 = vld [vmem:[#allocation4 + $0x130] sm:$0x77] }
  0xc9   :  { %1464 = vmatmul.bf16.vlgmr.msrb.gmra.mxu2 %v343_v35  ;;  %1477 = vmatmul.bf16.vlgmr.msrb.gmra.mxu3 %v344_v36  ;;  %v351_v35 = vpack.c.b16 %v250_v23, %v250_v23  ;;  %v352_v36 = vpack.c.b16 %v251_v24, %v251_v24  ;;  %v258_v23 = vunpack.c.l.b16 %v74_v17  ;;  %v259_v24 = vunpack.c.h.b16 %v74_v17  ;;  %v78_v17 = vld [vmem:[#allocation2 + $0x118] sm:$0xff] }
  0xca   :  { %1567 = vmatpush.bf16.xpose.msrb.mxu2 %v704_v39  ;;  %1580 = vmatpush.bf16.xpose.msrb.mxu3 %v705_v40  ;;  %v712_v39 = vpack.c.b16 %v611_v26, %v611_v26  ;;  %v713_v40 = vpack.c.b16 %v612_v27, %v612_v27  ;;  %v619_v26 = vunpack.c.l.b16 %v129_v20  ;;  %v620_v27 = vunpack.c.h.b16 %v129_v20  ;;  %v133_v20 = vld [vmem:[#allocation4 + $0x138] sm:$0x77] }
  0xcb   :  { %v1025_v46 = vpop.f32.mrf.mxu0  ;;  %v1038_v47 = vpop.f32.mrf.mxu1 }
  0xcc   :  { %v1049_v43 = vpop.f32.mrf.mxu2  ;;  %v1062_v44 = vpop.f32.mrf.mxu3 }
  0xcd   :  { %v1050_v45 = vadd.f32 %v1049_v43, %v1037_v42 }
  0xcf   :  { %v1063_v50 = vadd.f32 %v1062_v44, %v1050_v45 }
  0xd3   :  { %v1075_v1 = vpop.f32.mrf.mxu0  ;;  %v1088_v2 = vpop.f32.mrf.mxu1 }
  0xd4   :  { %v1051_v61 = vpop.f32.mrf.mxu2  ;;  %v1064_v62 = vpop.f32.mrf.mxu3  ;;  %v1076_v5 = vadd.f32 %v1075_v1, %v1063_v50 }
  0xd6   :  { %v1089_v10 = vadd.f32 %v1088_v2, %v1076_v5  ;;  %1490 = vmatmul.bf16.vlgmr.msra.gmra.mxu0 %v345_v63  ;;  %1503 = vmatmul.bf16.vlgmr.msra.gmra.mxu1 %v346_v0  ;;  %v353_v63 = vpack.c.b16 %v252_v53, %v252_v53  ;;  %v354_v0 = vpack.c.b16 %v253_v54, %v253_v54  ;;  %v260_v53 = vunpack.c.l.b16 %v75_v48 }
  0xd7   :  { %1593 = vmatpush.bf16.xpose.msra.mxu0 %v706_v6  ;;  %1606 = vmatpush.bf16.xpose.msra.mxu1 %v707_v9  ;;  %v714_v6 = vpack.c.b16 %v613_v57, %v613_v57  ;;  %v715_v9 = vpack.c.b16 %v614_v60, %v614_v60  ;;  %v261_v54 = vunpack.c.h.b16 %v75_v48  ;;  %v621_v57 = vunpack.c.l.b16 %v130_v51  ;;  %v79_v48 = vld [vmem:[#allocation2 + $0x120] sm:$0xff] }
  0xd8   :  { %v622_v60 = vunpack.c.h.b16 %v130_v51  ;;  %v134_v51 = vld [vmem:[#allocation4 + $0x140] sm:$0x77] }
  0xd9   :  { %1516 = vmatmul.bf16.vlgmr.msra.gmra.mxu2 %v347_v3  ;;  %1529 = vmatmul.bf16.vlgmr.msra.gmra.mxu3 %v348_v4  ;;  %v355_v3 = vpack.c.b16 %v254_v55, %v254_v55  ;;  %v356_v4 = vpack.c.b16 %v255_v56, %v255_v56  ;;  %v262_v55 = vunpack.c.l.b16 %v76_v49  ;;  %v263_v56 = vunpack.c.h.b16 %v76_v49  ;;  %v80_v49 = vld [vmem:[#allocation2 + $0x128] sm:$0xff] }
  0xda   :  { %1619 = vmatpush.bf16.xpose.msra.mxu2 %v708_v7  ;;  %1632 = vmatpush.bf16.xpose.msra.mxu3 %v709_v8  ;;  %v716_v7 = vpack.c.b16 %v615_v58, %v615_v58  ;;  %v717_v8 = vpack.c.b16 %v616_v59, %v616_v59  ;;  %v623_v58 = vunpack.c.l.b16 %v131_v52  ;;  %v624_v59 = vunpack.c.h.b16 %v131_v52  ;;  %v135_v52 = vld [vmem:[#allocation4 + $0x148] sm:$0x77] }
  0xdb   :  { %v1077_v14 = vpop.f32.mrf.mxu0  ;;  %v1090_v15 = vpop.f32.mrf.mxu1 }
  0xdc   :  { %v1101_v11 = vpop.f32.mrf.mxu2  ;;  %v1114_v12 = vpop.f32.mrf.mxu3 }
  0xdd   :  { %v1102_v13 = vadd.f32 %v1101_v11, %v1089_v10 }
  0xdf   :  { %v1115_v18 = vadd.f32 %v1114_v12, %v1102_v13 }
  0xe3   :  { %v1127_v33 = vpop.f32.mrf.mxu0  ;;  %v1140_v34 = vpop.f32.mrf.mxu1 }
  0xe4   :  { %v1103_v29 = vpop.f32.mrf.mxu2  ;;  %v1116_v30 = vpop.f32.mrf.mxu3  ;;  %v1128_v37 = vadd.f32 %v1127_v33, %v1115_v18 }
  0xe6   :  { %v1141_v42 = vadd.f32 %v1140_v34, %v1128_v37  ;;  %1542 = vmatmul.bf16.vlgmr.msrb.gmra.mxu0 %v349_v31  ;;  %1555 = vmatmul.bf16.vlgmr.msrb.gmra.mxu1 %v350_v32  ;;  %v357_v31 = vpack.c.b16 %v256_v21, %v256_v21  ;;  %v358_v32 = vpack.c.b16 %v257_v22, %v257_v22  ;;  %v264_v21 = vunpack.c.l.b16 %v77_v16 }
  0xe7   :  { %1645 = vmatpush.bf16.xpose.msrb.mxu0 %v710_v38  ;;  %1658 = vmatpush.bf16.xpose.msrb.mxu1 %v711_v41  ;;  %v718_v38 = vpack.c.b16 %v617_v25, %v617_v25  ;;  %v719_v41 = vpack.c.b16 %v618_v28, %v618_v28  ;;  %v265_v22 = vunpack.c.h.b16 %v77_v16  ;;  %v625_v25 = vunpack.c.l.b16 %v132_v19  ;;  %v81_v16 = vld [vmem:[#allocation2 + $0x130] sm:$0xff] }
  0xe8   :  { %v626_v28 = vunpack.c.h.b16 %v132_v19  ;;  %v136_v19 = vld [vmem:[#allocation4 + $0x150] sm:$0x77] }
  0xe9   :  { %1568 = vmatmul.bf16.vlgmr.msrb.gmra.mxu2 %v351_v35  ;;  %1581 = vmatmul.bf16.vlgmr.msrb.gmra.mxu3 %v352_v36  ;;  %v359_v35 = vpack.c.b16 %v258_v23, %v258_v23  ;;  %v360_v36 = vpack.c.b16 %v259_v24, %v259_v24  ;;  %v266_v23 = vunpack.c.l.b16 %v78_v17  ;;  %v267_v24 = vunpack.c.h.b16 %v78_v17  ;;  %v82_v17 = vld [vmem:[#allocation2 + $0x138] sm:$0xff] }
  0xea   :  { %1671 = vmatpush.bf16.xpose.msrb.mxu2 %v712_v39  ;;  %1684 = vmatpush.bf16.xpose.msrb.mxu3 %v713_v40  ;;  %v720_v39 = vpack.c.b16 %v619_v26, %v619_v26  ;;  %v721_v40 = vpack.c.b16 %v620_v27, %v620_v27  ;;  %v627_v26 = vunpack.c.l.b16 %v133_v20  ;;  %v628_v27 = vunpack.c.h.b16 %v133_v20  ;;  %v137_v20 = vld [vmem:[#allocation4 + $0x158] sm:$0x77] }
  0xeb   :  { %v1129_v46 = vpop.f32.mrf.mxu0  ;;  %v1142_v47 = vpop.f32.mrf.mxu1 }
  0xec   :  { %v1153_v43 = vpop.f32.mrf.mxu2  ;;  %v1166_v44 = vpop.f32.mrf.mxu3 }
  0xed   :  { %v1154_v45 = vadd.f32 %v1153_v43, %v1141_v42 }
  0xef   :  { %v1167_v50 = vadd.f32 %v1166_v44, %v1154_v45 }
  0xf3   :  { %v1179_v1 = vpop.f32.mrf.mxu0  ;;  %v1192_v2 = vpop.f32.mrf.mxu1 }
  0xf4   :  { %v1155_v61 = vpop.f32.mrf.mxu2  ;;  %v1168_v62 = vpop.f32.mrf.mxu3  ;;  %v1180_v5 = vadd.f32 %v1179_v1, %v1167_v50 }
  0xf6   :  { %v1193_v10 = vadd.f32 %v1192_v2, %v1180_v5  ;;  %1594 = vmatmul.bf16.vlgmr.msra.gmra.mxu0 %v353_v63  ;;  %1607 = vmatmul.bf16.vlgmr.msra.gmra.mxu1 %v354_v0  ;;  %v361_v63 = vpack.c.b16 %v260_v53, %v260_v53  ;;  %v362_v0 = vpack.c.b16 %v261_v54, %v261_v54  ;;  %v268_v53 = vunpack.c.l.b16 %v79_v48 }
  0xf7   :  { %1697 = vmatpush.bf16.xpose.msra.mxu0 %v714_v6  ;;  %1710 = vmatpush.bf16.xpose.msra.mxu1 %v715_v9  ;;  %v722_v6 = vpack.c.b16 %v621_v57, %v621_v57  ;;  %v723_v9 = vpack.c.b16 %v622_v60, %v622_v60  ;;  %v269_v54 = vunpack.c.h.b16 %v79_v48  ;;  %v629_v57 = vunpack.c.l.b16 %v134_v51  ;;  %v83_v48 = vld [vmem:[#allocation2 + $0x140] sm:$0xff] }
  0xf8   :  { %v630_v60 = vunpack.c.h.b16 %v134_v51  ;;  %v138_v51 = vld [vmem:[#allocation4 + $0x160] sm:$0x77] }
  0xf9   :  { %1620 = vmatmul.bf16.vlgmr.msra.gmra.mxu2 %v355_v3  ;;  %1633 = vmatmul.bf16.vlgmr.msra.gmra.mxu3 %v356_v4  ;;  %v363_v3 = vpack.c.b16 %v262_v55, %v262_v55  ;;  %v364_v4 = vpack.c.b16 %v263_v56, %v263_v56  ;;  %v270_v55 = vunpack.c.l.b16 %v80_v49  ;;  %v271_v56 = vunpack.c.h.b16 %v80_v49  ;;  %v84_v49 = vld [vmem:[#allocation2 + $0x148] sm:$0xff] }
  0xfa   :  { %1723 = vmatpush.bf16.xpose.msra.mxu2 %v716_v7  ;;  %1736 = vmatpush.bf16.xpose.msra.mxu3 %v717_v8  ;;  %v724_v7 = vpack.c.b16 %v623_v58, %v623_v58  ;;  %v725_v8 = vpack.c.b16 %v624_v59, %v624_v59  ;;  %v631_v58 = vunpack.c.l.b16 %v135_v52  ;;  %v632_v59 = vunpack.c.h.b16 %v135_v52  ;;  %v139_v52 = vld [vmem:[#allocation4 + $0x168] sm:$0x77] }
  0xfb   :  { %v1181_v14 = vpop.f32.mrf.mxu0  ;;  %v1194_v15 = vpop.f32.mrf.mxu1 }
  0xfc   :  { %v1205_v11 = vpop.f32.mrf.mxu2  ;;  %v1218_v12 = vpop.f32.mrf.mxu3 }
  0xfd   :  { %v1206_v13 = vadd.f32 %v1205_v11, %v1193_v10 }
  0xff   :  { %v1219_v18 = vadd.f32 %v1218_v12, %v1206_v13 }
 0x103   :  { %v1231_v33 = vpop.f32.mrf.mxu0  ;;  %v1244_v34 = vpop.f32.mrf.mxu1 }
 0x104   :  { %v1207_v29 = vpop.f32.mrf.mxu2  ;;  %v1220_v30 = vpop.f32.mrf.mxu3  ;;  %v1232_v37 = vadd.f32 %v1231_v33, %v1219_v18 }
 0x106   :  { %v1245_v42 = vadd.f32 %v1244_v34, %v1232_v37  ;;  %1646 = vmatmul.bf16.vlgmr.msrb.gmra.mxu0 %v357_v31  ;;  %1659 = vmatmul.bf16.vlgmr.msrb.gmra.mxu1 %v358_v32  ;;  %v365_v31 = vpack.c.b16 %v264_v21, %v264_v21  ;;  %v366_v32 = vpack.c.b16 %v265_v22, %v265_v22  ;;  %v272_v21 = vunpack.c.l.b16 %v81_v16 }
 0x107   :  { %1749 = vmatpush.bf16.xpose.msrb.mxu0 %v718_v38  ;;  %1762 = vmatpush.bf16.xpose.msrb.mxu1 %v719_v41  ;;  %v726_v38 = vpack.c.b16 %v625_v25, %v625_v25  ;;  %v727_v41 = vpack.c.b16 %v626_v28, %v626_v28  ;;  %v273_v22 = vunpack.c.h.b16 %v81_v16  ;;  %v633_v25 = vunpack.c.l.b16 %v136_v19  ;;  %v85_v16 = vld [vmem:[#allocation2 + $0x150] sm:$0xff] }
 0x108   :  { %v634_v28 = vunpack.c.h.b16 %v136_v19  ;;  %v140_v19 = vld [vmem:[#allocation4 + $0x170] sm:$0x77] }
 0x109   :  { %1672 = vmatmul.bf16.vlgmr.msrb.gmra.mxu2 %v359_v35  ;;  %1685 = vmatmul.bf16.vlgmr.msrb.gmra.mxu3 %v360_v36  ;;  %v367_v35 = vpack.c.b16 %v266_v23, %v266_v23  ;;  %v368_v36 = vpack.c.b16 %v267_v24, %v267_v24  ;;  %v274_v23 = vunpack.c.l.b16 %v82_v17  ;;  %v275_v24 = vunpack.c.h.b16 %v82_v17  ;;  %v86_v17 = vld [vmem:[#allocation2 + $0x158] sm:$0xff] }
 0x10a   :  { %1775 = vmatpush.bf16.xpose.msrb.mxu2 %v720_v39  ;;  %1788 = vmatpush.bf16.xpose.msrb.mxu3 %v721_v40  ;;  %v728_v39 = vpack.c.b16 %v627_v26, %v627_v26  ;;  %v729_v40 = vpack.c.b16 %v628_v27, %v628_v27  ;;  %v635_v26 = vunpack.c.l.b16 %v137_v20  ;;  %v636_v27 = vunpack.c.h.b16 %v137_v20  ;;  %v141_v20 = vld [vmem:[#allocation4 + $0x178] sm:$0x77] }
 0x10b   :  { %v1233_v46 = vpop.f32.mrf.mxu0  ;;  %v1246_v47 = vpop.f32.mrf.mxu1 }
 0x10c   :  { %v1257_v43 = vpop.f32.mrf.mxu2  ;;  %v1270_v44 = vpop.f32.mrf.mxu3 }
 0x10d   :  { %v1258_v45 = vadd.f32 %v1257_v43, %v1245_v42 }
 0x10f   :  { %v1271_v50 = vadd.f32 %v1270_v44, %v1258_v45 }
 0x113   :  { %v1283_v1 = vpop.f32.mrf.mxu0  ;;  %v1296_v2 = vpop.f32.mrf.mxu1 }
 0x114   :  { %v1259_v61 = vpop.f32.mrf.mxu2  ;;  %v1272_v62 = vpop.f32.mrf.mxu3  ;;  %v1284_v5 = vadd.f32 %v1283_v1, %v1271_v50 }
 0x116   :  { %v1297_v10 = vadd.f32 %v1296_v2, %v1284_v5  ;;  %1698 = vmatmul.bf16.vlgmr.msra.gmra.mxu0 %v361_v63  ;;  %1711 = vmatmul.bf16.vlgmr.msra.gmra.mxu1 %v362_v0  ;;  %v369_v63 = vpack.c.b16 %v268_v53, %v268_v53  ;;  %v370_v0 = vpack.c.b16 %v269_v54, %v269_v54  ;;  %v276_v53 = vunpack.c.l.b16 %v83_v48 }
 0x117   :  { %1801 = vmatpush.bf16.xpose.msra.mxu0 %v722_v6  ;;  %1814 = vmatpush.bf16.xpose.msra.mxu1 %v723_v9  ;;  %v730_v6 = vpack.c.b16 %v629_v57, %v629_v57  ;;  %v731_v9 = vpack.c.b16 %v630_v60, %v630_v60  ;;  %v277_v54 = vunpack.c.h.b16 %v83_v48  ;;  %v637_v57 = vunpack.c.l.b16 %v138_v51  ;;  %v87_v48 = vld [vmem:[#allocation2 + $0x160] sm:$0xff] }
 0x118   :  { %v638_v60 = vunpack.c.h.b16 %v138_v51  ;;  %v142_v51 = vld [vmem:[#allocation4 + $0x180] sm:$0x77] }
 0x119   :  { %1724 = vmatmul.bf16.vlgmr.msra.gmra.mxu2 %v363_v3  ;;  %1737 = vmatmul.bf16.vlgmr.msra.gmra.mxu3 %v364_v4  ;;  %v371_v3 = vpack.c.b16 %v270_v55, %v270_v55  ;;  %v372_v4 = vpack.c.b16 %v271_v56, %v271_v56  ;;  %v278_v55 = vunpack.c.l.b16 %v84_v49  ;;  %v279_v56 = vunpack.c.h.b16 %v84_v49  ;;  %v88_v49 = vld [vmem:[#allocation2 + $0x168] sm:$0xff] }
 0x11a   :  { %1827 = vmatpush.bf16.xpose.msra.mxu2 %v724_v7  ;;  %1840 = vmatpush.bf16.xpose.msra.mxu3 %v725_v8  ;;  %v732_v7 = vpack.c.b16 %v631_v58, %v631_v58  ;;  %v733_v8 = vpack.c.b16 %v632_v59, %v632_v59  ;;  %v639_v58 = vunpack.c.l.b16 %v139_v52  ;;  %v640_v59 = vunpack.c.h.b16 %v139_v52  ;;  %v143_v52 = vld [vmem:[#allocation4 + $0x188] sm:$0x77] }
 0x11b   :  { %v1285_v14 = vpop.f32.mrf.mxu0  ;;  %v1298_v15 = vpop.f32.mrf.mxu1 }
 0x11c   :  { %v1309_v11 = vpop.f32.mrf.mxu2  ;;  %v1322_v12 = vpop.f32.mrf.mxu3 }
 0x11d   :  { %v1310_v13 = vadd.f32 %v1309_v11, %v1297_v10 }
 0x11f   :  { %v1323_v18 = vadd.f32 %v1322_v12, %v1310_v13 }
 0x123   :  { %v1335_v33 = vpop.f32.mrf.mxu0  ;;  %v1348_v34 = vpop.f32.mrf.mxu1 }
 0x124   :  { %v1311_v29 = vpop.f32.mrf.mxu2  ;;  %v1324_v30 = vpop.f32.mrf.mxu3  ;;  %v1336_v37 = vadd.f32 %v1335_v33, %v1323_v18 }
 0x126   :  { %v1349_v42 = vadd.f32 %v1348_v34, %v1336_v37  ;;  %1750 = vmatmul.bf16.vlgmr.msrb.gmra.mxu0 %v365_v31  ;;  %1763 = vmatmul.bf16.vlgmr.msrb.gmra.mxu1 %v366_v32  ;;  %v373_v31 = vpack.c.b16 %v272_v21, %v272_v21  ;;  %v374_v32 = vpack.c.b16 %v273_v22, %v273_v22  ;;  %v280_v21 = vunpack.c.l.b16 %v85_v16 }
 0x127   :  { %1853 = vmatpush.bf16.xpose.msrb.mxu0 %v726_v38  ;;  %1866 = vmatpush.bf16.xpose.msrb.mxu1 %v727_v41  ;;  %v734_v38 = vpack.c.b16 %v633_v25, %v633_v25  ;;  %v735_v41 = vpack.c.b16 %v634_v28, %v634_v28  ;;  %v281_v22 = vunpack.c.h.b16 %v85_v16  ;;  %v641_v25 = vunpack.c.l.b16 %v140_v19 }
 0x128   :  { %v642_v28 = vunpack.c.h.b16 %v140_v19 }
 0x129   :  { %1776 = vmatmul.bf16.vlgmr.msrb.gmra.mxu2 %v367_v35  ;;  %1789 = vmatmul.bf16.vlgmr.msrb.gmra.mxu3 %v368_v36  ;;  %v375_v35 = vpack.c.b16 %v274_v23, %v274_v23  ;;  %v376_v36 = vpack.c.b16 %v275_v24, %v275_v24  ;;  %v282_v23 = vunpack.c.l.b16 %v86_v17  ;;  %v283_v24 = vunpack.c.h.b16 %v86_v17  ;;  %v89_v17 = vld [vmem:[#allocation2 + $0x170] sm:$0xff] }
 0x12a   :  { %1879 = vmatpush.bf16.xpose.msrb.mxu2 %v728_v39  ;;  %1892 = vmatpush.bf16.xpose.msrb.mxu3 %v729_v40  ;;  %v736_v39 = vpack.c.b16 %v635_v26, %v635_v26  ;;  %v737_v40 = vpack.c.b16 %v636_v27, %v636_v27  ;;  %v643_v26 = vunpack.c.l.b16 %v141_v20  ;;  %v644_v27 = vunpack.c.h.b16 %v141_v20 }
 0x12b   :  { %v1337_v46 = vpop.f32.mrf.mxu0  ;;  %v1350_v47 = vpop.f32.mrf.mxu1 }
 0x12c   :  { %v1361_v43 = vpop.f32.mrf.mxu2  ;;  %v1374_v44 = vpop.f32.mrf.mxu3 }
 0x12d   :  { %v1362_v45 = vadd.f32 %v1361_v43, %v1349_v42 }
 0x12f   :  { %v1375_v50 = vadd.f32 %v1374_v44, %v1362_v45 }
 0x133   :  { %v1387_v1 = vpop.f32.mrf.mxu0  ;;  %v1400_v2 = vpop.f32.mrf.mxu1 }
 0x134   :  { %v1363_v61 = vpop.f32.mrf.mxu2  ;;  %v1376_v62 = vpop.f32.mrf.mxu3  ;;  %v1388_v5 = vadd.f32 %v1387_v1, %v1375_v50 }
 0x136   :  { %v1401_v10 = vadd.f32 %v1400_v2, %v1388_v5  ;;  %1802 = vmatmul.bf16.vlgmr.msra.gmra.mxu0 %v369_v63  ;;  %1815 = vmatmul.bf16.vlgmr.msra.gmra.mxu1 %v370_v0  ;;  %v377_v63 = vpack.c.b16 %v276_v53, %v276_v53  ;;  %v378_v0 = vpack.c.b16 %v277_v54, %v277_v54  ;;  %v284_v53 = vunpack.c.l.b16 %v87_v48 }
 0x137   :  { %1905 = vmatpush.bf16.xpose.msra.mxu0 %v730_v6  ;;  %1918 = vmatpush.bf16.xpose.msra.mxu1 %v731_v9  ;;  %v738_v6 = vpack.c.b16 %v637_v57, %v637_v57  ;;  %v739_v9 = vpack.c.b16 %v638_v60, %v638_v60  ;;  %v285_v54 = vunpack.c.h.b16 %v87_v48  ;;  %v645_v57 = vunpack.c.l.b16 %v142_v51 }
 0x138   :  { %v646_v60 = vunpack.c.h.b16 %v142_v51 }
 0x139   :  { %1828 = vmatmul.bf16.vlgmr.msra.gmra.mxu2 %v371_v3  ;;  %1841 = vmatmul.bf16.vlgmr.msra.gmra.mxu3 %v372_v4  ;;  %v379_v3 = vpack.c.b16 %v278_v55, %v278_v55  ;;  %v380_v4 = vpack.c.b16 %v279_v56, %v279_v56  ;;  %v286_v55 = vunpack.c.l.b16 %v88_v49  ;;  %v287_v56 = vunpack.c.h.b16 %v88_v49 }
 0x13a   :  { %1931 = vmatpush.bf16.xpose.msra.mxu2 %v732_v7  ;;  %1944 = vmatpush.bf16.xpose.msra.mxu3 %v733_v8  ;;  %v740_v7 = vpack.c.b16 %v639_v58, %v639_v58  ;;  %v741_v8 = vpack.c.b16 %v640_v59, %v640_v59  ;;  %v647_v58 = vunpack.c.l.b16 %v143_v52  ;;  %v648_v59 = vunpack.c.h.b16 %v143_v52 }
 0x13b   :  { %v1389_v14 = vpop.f32.mrf.mxu0  ;;  %v1402_v15 = vpop.f32.mrf.mxu1 }
 0x13c   :  { %v1413_v11 = vpop.f32.mrf.mxu2  ;;  %v1426_v12 = vpop.f32.mrf.mxu3 }
 0x13d   :  { %v1414_v13 = vadd.f32 %v1413_v11, %v1401_v10 }
 0x13f   :  { %v1427_v18 = vadd.f32 %v1426_v12, %v1414_v13 }
 0x143   :  { %v1439_v33 = vpop.f32.mrf.mxu0  ;;  %v1452_v34 = vpop.f32.mrf.mxu1 }
 0x144   :  { %v1415_v29 = vpop.f32.mrf.mxu2  ;;  %v1428_v30 = vpop.f32.mrf.mxu3  ;;  %v1440_v37 = vadd.f32 %v1439_v33, %v1427_v18 }
 0x146   :  { %v1453_v42 = vadd.f32 %v1452_v34, %v1440_v37  ;;  %1854 = vmatmul.bf16.vlgmr.msrb.gmra.mxu0 %v373_v31  ;;  %1867 = vmatmul.bf16.vlgmr.msrb.gmra.mxu1 %v374_v32  ;;  %v381_v31 = vpack.c.b16 %v280_v21, %v280_v21  ;;  %v382_v32 = vpack.c.b16 %v281_v22, %v281_v22  ;;  %v288_v21 = vunpack.c.l.b16 %v89_v17 }
 0x147   :  { %1957 = vmatpush.bf16.xpose.msrb.mxu0 %v734_v38  ;;  %1970 = vmatpush.bf16.xpose.msrb.mxu1 %v735_v41  ;;  %v742_v38 = vpack.c.b16 %v641_v25, %v641_v25  ;;  %v743_v41 = vpack.c.b16 %v642_v28, %v642_v28  ;;  %v289_v22 = vunpack.c.h.b16 %v89_v17 }
 0x148   :  { %v389_v28 = vpack.c.b16 %v288_v21, %v288_v21 }
 0x149   :  { %1880 = vmatmul.bf16.vlgmr.msrb.gmra.mxu2 %v375_v35  ;;  %1893 = vmatmul.bf16.vlgmr.msrb.gmra.mxu3 %v376_v36  ;;  %v383_v35 = vpack.c.b16 %v282_v23, %v282_v23  ;;  %v384_v36 = vpack.c.b16 %v283_v24, %v283_v24 }
 0x14a   :  { %1983 = vmatpush.bf16.xpose.msrb.mxu2 %v736_v39  ;;  %1996 = vmatpush.bf16.xpose.msrb.mxu3 %v737_v40  ;;  %v744_v39 = vpack.c.b16 %v643_v26, %v643_v26  ;;  %v745_v40 = vpack.c.b16 %v644_v27, %v644_v27 }
 0x14b   :  { %v1441_v46 = vpop.f32.mrf.mxu0  ;;  %v1454_v47 = vpop.f32.mrf.mxu1 }
 0x14c   :  { %v1465_v43 = vpop.f32.mrf.mxu2  ;;  %v1478_v44 = vpop.f32.mrf.mxu3 }
 0x14d   :  { %v1466_v45 = vadd.f32 %v1465_v43, %v1453_v42 }
 0x14f   :  { %v1479_v50 = vadd.f32 %v1478_v44, %v1466_v45 }
 0x153   :  { %v1491_v1 = vpop.f32.mrf.mxu0  ;;  %v1504_v2 = vpop.f32.mrf.mxu1 }
 0x154   :  { %v1467_v61 = vpop.f32.mrf.mxu2  ;;  %v1480_v62 = vpop.f32.mrf.mxu3  ;;  %v1492_v5 = vadd.f32 %v1491_v1, %v1479_v50 }
 0x156   :  { %v1505_v10 = vadd.f32 %v1504_v2, %v1492_v5  ;;  %1906 = vmatmul.bf16.vlgmr.msra.gmra.mxu0 %v377_v63  ;;  %1919 = vmatmul.bf16.vlgmr.msra.gmra.mxu1 %v378_v0  ;;  %v385_v63 = vpack.c.b16 %v284_v53, %v284_v53  ;;  %v386_v0 = vpack.c.b16 %v285_v54, %v285_v54 }
 0x157   :  { %2009 = vmatpush.bf16.xpose.msra.mxu0 %v738_v6  ;;  %2022 = vmatpush.bf16.xpose.msra.mxu1 %v739_v9  ;;  %v746_v6 = vpack.c.b16 %v645_v57, %v645_v57  ;;  %v747_v9 = vpack.c.b16 %v646_v60, %v646_v60 }
 0x159   :  { %1932 = vmatmul.bf16.vlgmr.msra.gmra.mxu2 %v379_v3  ;;  %1945 = vmatmul.bf16.vlgmr.msra.gmra.mxu3 %v380_v4  ;;  %v387_v3 = vpack.c.b16 %v286_v55, %v286_v55  ;;  %v388_v4 = vpack.c.b16 %v287_v56, %v287_v56 }
 0x15a   :  { %2035 = vmatpush.bf16.xpose.msra.mxu2 %v740_v7  ;;  %2048 = vmatpush.bf16.xpose.msra.mxu3 %v741_v8  ;;  %v748_v7 = vpack.c.b16 %v647_v58, %v647_v58  ;;  %v749_v8 = vpack.c.b16 %v648_v59, %v648_v59 }
 0x15b   :  { %v1493_v14 = vpop.f32.mrf.mxu0  ;;  %v1506_v15 = vpop.f32.mrf.mxu1 }
 0x15c   :  { %v1517_v11 = vpop.f32.mrf.mxu2  ;;  %v1530_v12 = vpop.f32.mrf.mxu3 }
 0x15d   :  { %v1518_v13 = vadd.f32 %v1517_v11, %v1505_v10 }
 0x15f   :  { %v1531_v18 = vadd.f32 %v1530_v12, %v1518_v13  ;;  %v144_v13 = vld [vmem:[#allocation4 + $0x190] sm:$0x7] }
 0x160   :  { %v649_v20 = vunpack.c.l.b16 %v144_v13 }
 0x162   :  { %v750_v25 = vpack.c.b16 %v649_v20, %v649_v20 }
 0x163   :  { %v1543_v33 = vpop.f32.mrf.mxu0  ;;  %v1556_v34 = vpop.f32.mrf.mxu1 }
 0x164   :  { %v1519_v29 = vpop.f32.mrf.mxu2  ;;  %v1532_v30 = vpop.f32.mrf.mxu3  ;;  %v1544_v37 = vadd.f32 %v1543_v33, %v1531_v18  ;;  %v90_v18 = vld [vmem:[#allocation2 + $0x178] sm:$0xff] }
 0x165   :  { %v290_v23 = vunpack.c.l.b16 %v90_v18  ;;  %v291_v24 = vunpack.c.h.b16 %v90_v18  ;;  %v390_v29 = vpack.c.b16 %v289_v22, %v289_v22 }
 0x166   :  { %v1557_v42 = vadd.f32 %v1556_v34, %v1544_v37  ;;  %1958 = vmatmul.bf16.vlgmr.msrb.gmra.mxu0 %v381_v31  ;;  %1971 = vmatmul.bf16.vlgmr.msrb.gmra.mxu1 %v382_v32 }
 0x167   :  { %2061 = vmatpush.bf16.xpose.msrb.mxu0 %v742_v38  ;;  %2074 = vmatpush.bf16.xpose.msrb.mxu1 %v743_v41  ;;  %v391_v32 = vpack.c.b16 %v290_v23, %v290_v23  ;;  %v392_v33 = vpack.c.b16 %v291_v24, %v291_v24 }
 0x169   :  { %1984 = vmatmul.bf16.vlgmr.msrb.gmra.mxu2 %v383_v35  ;;  %1997 = vmatmul.bf16.vlgmr.msrb.gmra.mxu3 %v384_v36  ;;  %v856_v35 = vsel %vm851_vm0, %v750_v25, 0 }
 0x16a   :  { %2087 = vmatpush.bf16.xpose.msrb.mxu2 %v744_v39  ;;  %2100 = vmatpush.bf16.xpose.msrb.mxu3 %v745_v40 }
 0x16b   :  { %v1545_v46 = vpop.f32.mrf.mxu0  ;;  %v1558_v47 = vpop.f32.mrf.mxu1 }
 0x16c   :  { %v1569_v43 = vpop.f32.mrf.mxu2  ;;  %v1582_v44 = vpop.f32.mrf.mxu3 }
 0x16d   :  { %v1570_v45 = vadd.f32 %v1569_v43, %v1557_v42  ;;  %v91_v42 = vld [vmem:[#allocation2 + $0x180] sm:$0xff]  ;;  %v92_v43 = vld [vmem:[#allocation2 + $0x188] sm:$0xff] }
 0x16e   :  { %v293_v46 = vunpack.c.h.b16 %v91_v42  ;;  %v294_v47 = vunpack.c.l.b16 %v92_v43  ;;  %v295_v48 = vunpack.c.h.b16 %v92_v43 }
 0x16f   :  { %v1583_v50 = vadd.f32 %v1582_v44, %v1570_v45  ;;  %v292_v45 = vunpack.c.l.b16 %v91_v42 }
 0x170   :  { %v394_v52 = vpack.c.b16 %v293_v46, %v293_v46  ;;  %v395_v55 = vpack.c.b16 %v294_v47, %v294_v47  ;;  %v396_v56 = vpack.c.b16 %v295_v48, %v295_v48 }
 0x171   :  { %v393_v51 = vpack.c.b16 %v292_v45, %v292_v45 }
 0x173   :  { %v1595_v1 = vpop.f32.mrf.mxu0  ;;  %v1608_v2 = vpop.f32.mrf.mxu1 }
 0x174   :  { %v1571_v61 = vpop.f32.mrf.mxu2  ;;  %v1584_v62 = vpop.f32.mrf.mxu3  ;;  %v1596_v5 = vadd.f32 %v1595_v1, %v1583_v50 }
 0x176   :  { %v1609_v10 = vadd.f32 %v1608_v2, %v1596_v5  ;;  %2010 = vmatmul.bf16.vlgmr.msra.gmra.mxu0 %v385_v63  ;;  %2023 = vmatmul.bf16.vlgmr.msra.gmra.mxu1 %v386_v0  ;;  %v93_v0 = vld [vmem:[#allocation2 + $0x190] sm:$0xf] }
 0x177   :  { %2113 = vmatpush.bf16.xpose.msra.mxu0 %v746_v6  ;;  %2126 = vmatpush.bf16.xpose.msra.mxu1 %v747_v9  ;;  %v296_v2 = vunpack.c.l.b16 %v93_v0 }
 0x179   :  { %2036 = vmatmul.bf16.vlgmr.msra.gmra.mxu2 %v387_v3  ;;  %2049 = vmatmul.bf16.vlgmr.msra.gmra.mxu3 %v388_v4  ;;  %v397_v5 = vpack.c.b16 %v296_v2, %v296_v2 }
 0x17a   :  { %2139 = vmatpush.bf16.xpose.msra.mxu2 %v748_v7  ;;  %2152 = vmatpush.bf16.xpose.msra.mxu3 %v749_v8 }
 0x17b   :  { %v1597_v15 = vpop.f32.mrf.mxu0  ;;  %v1610_v16 = vpop.f32.mrf.mxu1 }
 0x17c   :  { %v1621_v11 = vpop.f32.mrf.mxu2  ;;  %v1634_v12 = vpop.f32.mrf.mxu3 }
 0x17d   :  { %v1622_v14 = vadd.f32 %v1621_v11, %v1609_v10 }
 0x17f   :  { %v1635_v19 = vadd.f32 %v1634_v12, %v1622_v14 }
 0x183   :  { %v1647_v30 = vpop.f32.mrf.mxu0  ;;  %v1660_v31 = vpop.f32.mrf.mxu1 }
 0x184   :  { %v1623_v26 = vpop.f32.mrf.mxu2  ;;  %v1636_v27 = vpop.f32.mrf.mxu3  ;;  %v1648_v34 = vadd.f32 %v1647_v30, %v1635_v19 }
 0x186   :  { %v1661_v36 = vadd.f32 %v1660_v31, %v1648_v34  ;;  %2062 = vmatmul.bf16.vlgmr.msrb.gmra.mxu0 %v389_v28  ;;  %2075 = vmatmul.bf16.vlgmr.msrb.gmra.mxu1 %v390_v29 }
 0x187   :  { %2165 = vmatpush.bf16.xpose.msrb.mxu0 %v856_v35 }
 0x189   :  { %2088 = vmatmul.bf16.vlgmr.msrb.gmra.mxu2 %v391_v32  ;;  %2101 = vmatmul.bf16.vlgmr.msrb.gmra.mxu3 %v392_v33 }
 0x18b   :  { %v1649_v40 = vpop.f32.mrf.mxu0  ;;  %v1662_v41 = vpop.f32.mrf.mxu1 }
 0x18c   :  { %v1673_v37 = vpop.f32.mrf.mxu2  ;;  %v1686_v38 = vpop.f32.mrf.mxu3 }
 0x18d   :  { %v1674_v39 = vadd.f32 %v1673_v37, %v1661_v36 }
 0x18f   :  { %v1687_v44 = vadd.f32 %v1686_v38, %v1674_v39 }
 0x193   :  { %v1699_v53 = vpop.f32.mrf.mxu0  ;;  %v1712_v54 = vpop.f32.mrf.mxu1 }
 0x194   :  { %v1675_v49 = vpop.f32.mrf.mxu2  ;;  %v1688_v50 = vpop.f32.mrf.mxu3  ;;  %v1700_v57 = vadd.f32 %v1699_v53, %v1687_v44 }
 0x196   :  { %v1713_v58 = vadd.f32 %v1712_v54, %v1700_v57  ;;  %2114 = vmatmul.bf16.vlgmr.msra.gmra.mxu0 %v393_v51  ;;  %2127 = vmatmul.bf16.vlgmr.msra.gmra.mxu1 %v394_v52 }
 0x199   :  { %2140 = vmatmul.bf16.vlgmr.msra.gmra.mxu2 %v395_v55  ;;  %2153 = vmatmul.bf16.vlgmr.msra.gmra.mxu3 %v396_v56 }
 0x19b   :  { %v1701_v62 = vpop.f32.mrf.mxu0  ;;  %v1714_v63 = vpop.f32.mrf.mxu1 }
 0x19c   :  { %v1725_v59 = vpop.f32.mrf.mxu2  ;;  %v1738_v60 = vpop.f32.mrf.mxu3 }
 0x19d   :  { %v1726_v61 = vadd.f32 %v1725_v59, %v1713_v58 }
 0x19f   :  { %v1739_v1 = vadd.f32 %v1738_v60, %v1726_v61 }
 0x1a3   :  { %v1751_v6 = vpop.f32.mrf.mxu0  ;;  %v1764_v7 = vpop.f32.mrf.mxu1 }
 0x1a4   :  { %v1727_v3 = vpop.f32.mrf.mxu2  ;;  %v1740_v4 = vpop.f32.mrf.mxu3  ;;  %v1752_v8 = vadd.f32 %v1751_v6, %v1739_v1 }
 0x1a6   :  { %v1765_v9 = vadd.f32 %v1764_v7, %v1752_v8  ;;  %2209 = vmatmul.msk.bf16.vlgmr.msrb.gmra.mxu0 %vm851_vm0, %v397_v5 }
 0x1ab   :  { %v1753_v12 = vpop.f32.mrf.mxu0  ;;  %v1766_v13 = vpop.f32.mrf.mxu1 }
 0x1ac   :  { %v1777_v10 = vpop.f32.mrf.mxu2  ;;  %v1790_v11 = vpop.f32.mrf.mxu3 }
 0x1ad   :  { %v1778_v26 = vadd.f32 %v1777_v10, %v1765_v9 }
 0x1af   :  { %v1791_v31 = vadd.f32 %v1790_v11, %v1778_v26 }
 0x1b3   :  { %v1803_v16 = vpop.f32.mrf.mxu0  ;;  %v1816_v17 = vpop.f32.mrf.mxu1 }
 0x1b4   :  { %v1779_v14 = vpop.f32.mrf.mxu2  ;;  %v1792_v15 = vpop.f32.mrf.mxu3  ;;  %v1804_v32 = vadd.f32 %v1803_v16, %v1791_v31 }
 0x1b6   :  { %v1817_v37 = vadd.f32 %v1816_v17, %v1804_v32 }
 0x1bb   :  { %v1805_v20 = vpop.f32.mrf.mxu0  ;;  %v1818_v21 = vpop.f32.mrf.mxu1 }
 0x1bc   :  { %v1829_v18 = vpop.f32.mrf.mxu2  ;;  %v1842_v19 = vpop.f32.mrf.mxu3 }
 0x1bd   :  { %v1830_v38 = vadd.f32 %v1829_v18, %v1817_v37 }
 0x1bf   :  { %v1843_v39 = vadd.f32 %v1842_v19, %v1830_v38 }
 0x1c3   :  { %v1855_v24 = vpop.f32.mrf.mxu0  ;;  %v1868_v25 = vpop.f32.mrf.mxu1 }
 0x1c4   :  { %v1831_v22 = vpop.f32.mrf.mxu2  ;;  %v1844_v23 = vpop.f32.mrf.mxu3  ;;  %v1856_v44 = vadd.f32 %v1855_v24, %v1843_v39 }
 0x1c6   :  { %v1869_v45 = vadd.f32 %v1868_v25, %v1856_v44 }
 0x1cb   :  { %v1857_v29 = vpop.f32.mrf.mxu0  ;;  %v1870_v30 = vpop.f32.mrf.mxu1 }
 0x1cc   :  { %v1881_v27 = vpop.f32.mrf.mxu2  ;;  %v1894_v28 = vpop.f32.mrf.mxu3 }
 0x1cd   :  { %v1882_v46 = vadd.f32 %v1881_v27, %v1869_v45 }
 0x1cf   :  { %v1895_v51 = vadd.f32 %v1894_v28, %v1882_v46 }
 0x1d3   :  { %v1907_v35 = vpop.f32.mrf.mxu0  ;;  %v1920_v36 = vpop.f32.mrf.mxu1 }
 0x1d4   :  { %v1883_v33 = vpop.f32.mrf.mxu2  ;;  %v1896_v34 = vpop.f32.mrf.mxu3  ;;  %v1908_v52 = vadd.f32 %v1907_v35, %v1895_v51 }
 0x1d6   :  { %v1921_v57 = vadd.f32 %v1920_v36, %v1908_v52 }
 0x1db   :  { %v1909_v42 = vpop.f32.mrf.mxu0  ;;  %v1922_v43 = vpop.f32.mrf.mxu1 }
 0x1dc   :  { %v1933_v40 = vpop.f32.mrf.mxu2  ;;  %v1946_v41 = vpop.f32.mrf.mxu3 }
 0x1dd   :  { %v1934_v58 = vadd.f32 %v1933_v40, %v1921_v57 }
 0x1df   :  { %v1947_v59 = vadd.f32 %v1946_v41, %v1934_v58  ;;  %v2273_v41 = vmov 2  }
 0x1e0   :  { %2214 = vset.pattern.permute.xlu0 %v2273_v41 }
 0x1e3   :  { %v1959_v49 = vpop.f32.mrf.mxu0  ;;  %v1972_v50 = vpop.f32.mrf.mxu1 }
 0x1e4   :  { %v1935_v47 = vpop.f32.mrf.mxu2  ;;  %v1948_v48 = vpop.f32.mrf.mxu3  ;;  %v1960_v0 = vadd.f32 %v1959_v49, %v1947_v59 }
 0x1e6   :  { %v1973_v1 = vadd.f32 %v1972_v50, %v1960_v0 }
 0x1eb   :  { %v1961_v55 = vpop.f32.mrf.mxu0  ;;  %v1974_v56 = vpop.f32.mrf.mxu1 }
 0x1ec   :  { %v1985_v53 = vpop.f32.mrf.mxu2  ;;  %v1998_v54 = vpop.f32.mrf.mxu3 }
 0x1ed   :  { %v1986_v2 = vadd.f32 %v1985_v53, %v1973_v1 }
 0x1ef   :  { %v1999_v7 = vadd.f32 %v1998_v54, %v1986_v2  ;;  %v2215_v54 = vld [vmem:[%s2310_s2] ss:$0 sm:$0xff] }
 0x1f3   :  { %v2011_v62 = vpop.f32.mrf.mxu0  ;;  %v2024_v63 = vpop.f32.mrf.mxu1 }
 0x1f4   :  { %v1987_v60 = vpop.f32.mrf.mxu2  ;;  %v2000_v61 = vpop.f32.mrf.mxu3  ;;  %v2012_v8 = vadd.f32 %v2011_v62, %v1999_v7 }
 0x1f6   :  { %v2025_v13 = vadd.f32 %v2024_v63, %v2012_v8 }
 0x1fb   :  { %v2013_v5 = vpop.f32.mrf.mxu0  ;;  %v2026_v6 = vpop.f32.mrf.mxu1 }
 0x1fc   :  { %v2037_v3 = vpop.f32.mrf.mxu2  ;;  %v2050_v4 = vpop.f32.mrf.mxu3 }
 0x1fd   :  { %v2038_v14 = vadd.f32 %v2037_v3, %v2025_v13 }
 0x1ff   :  { %v2051_v15 = vadd.f32 %v2050_v4, %v2038_v14 }
 0x203   :  { %v2063_v11 = vpop.f32.mrf.mxu0  ;;  %v2076_v12 = vpop.f32.mrf.mxu1 }
 0x204   :  { %v2039_v9 = vpop.f32.mrf.mxu2  ;;  %v2052_v10 = vpop.f32.mrf.mxu3  ;;  %v2064_v20 = vadd.f32 %v2063_v11, %v2051_v15 }
 0x206   :  { %v2077_v21 = vadd.f32 %v2076_v12, %v2064_v20 }
 0x20b   :  { %v2065_v18 = vpop.f32.mrf.mxu0  ;;  %v2078_v19 = vpop.f32.mrf.mxu1 }
 0x20c   :  { %v2089_v16 = vpop.f32.mrf.mxu2  ;;  %v2102_v17 = vpop.f32.mrf.mxu3 }
 0x20d   :  { %v2090_v22 = vadd.f32 %v2089_v16, %v2077_v21 }
 0x20f   :  { %v2103_v27 = vadd.f32 %v2102_v17, %v2090_v22 }
 0x213   :  { %v2115_v25 = vpop.f32.mrf.mxu0  ;;  %v2128_v26 = vpop.f32.mrf.mxu1 }
 0x214   :  { %v2091_v23 = vpop.f32.mrf.mxu2  ;;  %v2104_v24 = vpop.f32.mrf.mxu3  ;;  %v2116_v28 = vadd.f32 %v2115_v25, %v2103_v27 }
 0x216   :  { %v2129_v33 = vadd.f32 %v2128_v26, %v2116_v28 }
 0x21b   :  { %v2117_v31 = vpop.f32.mrf.mxu0  ;;  %v2130_v32 = vpop.f32.mrf.mxu1 }
 0x21c   :  { %v2141_v29 = vpop.f32.mrf.mxu2  ;;  %v2154_v30 = vpop.f32.mrf.mxu3 }
 0x21d   :  { %v2142_v34 = vadd.f32 %v2141_v29, %v2129_v33 }
 0x21f   :  { %v2155_v35 = vadd.f32 %v2154_v30, %v2142_v34 }
 0x223   :  { %v2167_v38 = vpop.f32.mrf.mxu0 }
 0x224   :  { %v2143_v36 = vpop.f32.mrf.mxu2  ;;  %v2156_v37 = vpop.f32.mrf.mxu3  ;;  %v2168_v39 = vadd.f32 %v2167_v38, %v2155_v35 }
 0x226   :  { %2172 = vrot.lane.b32.xlu0 %v2168_v39, %s2272_s0 }
 0x22b   :  { %v2169_v40 = vpop.f32.mrf.mxu0 }
 0x298   :  { %v2173_v42 = vpop.permute.xlu0 %2172 }
 0x299   :  { %v2175_v43 = vadd.f32 %v2173_v42, %v2168_v39 }
 0x29b   :  { %2216 = vrcp.f32 %v2175_v43  ;;  %v2187_v47 = vand.u32 2147483648, %v2175_v43  ;;  %v2185_v49 = vand.u32 2147483647, %v2175_v43  ;;  %vm2181_vm2 = vweird.f32 %v2175_v43 }
 0x29d   :  { %v2188_v51 = vor.u32 1.1754944e-38, %v2187_v47  ;;  %vm2186_vm4 = vcmp.eq.f32.partialorder %v2185_v49, 8.507059e+37 }
 0x2a1   :  { %v2217_v44 = vpop.eup %2216 }
 0x2a2   :  { %v2177_v45 = vmul.f32 %v2217_v44, %v2175_v43  ;;  %vm2182_vm1 = vweird.f32 %v2217_v44 }
 0x2a3   :  { %vm2183_vm3 = vmor %vm2181_vm2, %vm2182_vm1 }
 0x2a4   :  { %v2178_v46 = vsub.f32 1.0, %v2177_v45 }
 0x2a6   :  { %v2179_v48 = vmul.f32 %v2217_v44, %v2178_v46 }
 0x2a8   :  { %v2180_v50 = vadd.f32 %v2217_v44, %v2179_v48 }
 0x2aa   :  { %v2184_v52 = vsel %vm2183_vm3, %v2217_v44, %v2180_v50 }
 0x2ab   :  { %v2189_v53 = vsel %vm2186_vm4, %v2188_v51, %v2184_v52 }
 0x2ac   :  { %2192 = vperm.xlu0 %2214, %v2189_v53  }
 0x31e   :  { %v2193_v55 = vpop.permute.xlu0 %2192 }
 0x31f   :  { %v2195_v56 = vmul.f32 %v2193_v55, %v2175_v43 }
 0x321   :  { %v2200_v57 = vadd.f32 %v2215_v54, %v2195_v56 }
 0x323   :  { %2202 = vst.msk [vmem:[%s2311_s3] sm:$0xff] %vm2201_vm5, %v2200_v57 }
 0x324   :  { %2207 = vsyncpa [#allocation3], 1 }
 0x325   :  { %2208 = vsyncpa [#allocation5], 1 }

</bundles_post_ra>
